<compile_context>
chip_gen: v7x
topology: tpu7x:2x2x1
jax: 0.10.0
libtpu: 0.0.40
codegen_flags: <defaults>
</compile_context>

<pallas_src>
import jax
import jax.numpy as jnp
from jax.experimental import pallas as pl
from jax.experimental.pallas import tpu as pltpu


NUM_CLASSES = 3
FEAT_DIM = 1000      # output dim of the "pretrained" backbone stand-in
HID_DIM = 100        # first head linear

FEAT_PAD = 1024      # lane-dense padding of FEAT_DIM
HID_PAD = 128        # lane-dense padding of HID_DIM
OUT_PAD = 128        # lane-dense padding of NUM_CLASSES (sliced in wrapper)


def _round_up(x, m):
    return ((x + m - 1) // m) * m


def _cdiv(a, b):
    return -(-a // b)


def _chip_config():
    """Per-generation tiling knobs (safe fallbacks if detection fails)."""
    kind = ""
    try:
        kind = jax.devices()[0].device_kind.lower()
    except Exception:
        pass
    if "v7" in kind or "7x" in kind:
        # 64 MiB physical VMEM, 2 TensorCores: modest K tiles, split the
        # FEAT columns across the cores via a "parallel" leading grid axis.
        return {"tk_max": 4096, "vmem_limit": None, "n_split": 2}
    if "v6" in kind or "v5" in kind:
        # 128 MiB physical VMEM, 1 TensorCore: big K tiles, raised scoped
        # VMEM limit (defaults are 16/32 MiB on v5e/v6e).
        return {"tk_max": 8192, "vmem_limit": 64 * 1024 * 1024, "n_split": 1}
    # Unknown chip: conservative (fits a 16 MiB scoped-VMEM default).
    return {"tk_max": 2048, "vmem_limit": None, "n_split": 1}


# ----------------------------------------------------------------------------
# Kernels
# ----------------------------------------------------------------------------

def backbone_kernel(x_ref, wb_ref, bb_ref, feat_ref, acc_ref):
    """One (column-block j, K-step k) tile of the backbone weight stream."""
    k = pl.program_id(1)

    @pl.when(k == 0)
    def _():
        acc_ref[...] = jnp.zeros_like(acc_ref)

    # (B_pad, TK) bf16 @ (TK, TN) bf16 -> f32 accumulation in VMEM scratch.
    acc_ref[...] += jnp.dot(x_ref[...], wb_ref[...],
                            preferred_element_type=jnp.float32)

    @pl.when(k == pl.num_programs(1) - 1)
    def _():
        feat_ref[...] = acc_ref[...] + bb_ref[...]


def head_kernel(feat_ref, w1_ref, b1_ref, w2_ref, b2_ref, out_ref):
    """Linear(1000,100) -> ReLU -> Linear(100,3) -> sigmoid, one shot."""
    feat = feat_ref[...]
    h = jnp.dot(feat.astype(jnp.bfloat16), w1_ref[...],
                preferred_element_type=jnp.float32) + b1_ref[...]
    h = jnp.maximum(h, 0.0)
    logits = jnp.dot(h.astype(jnp.bfloat16), w2_ref[...],
                     preferred_element_type=jnp.float32) + b2_ref[...]
    out_ref[...] = jax.nn.sigmoid(logits)


# ----------------------------------------------------------------------------
# One-time parameter preparation (hoisted out of the forward path)
# ----------------------------------------------------------------------------

def prepare_params(params):
    """Pad + cast weights to the kernel layouts ONCE (call per model, reuse)."""
    F = params["wb"].shape[0]
    cfg = _chip_config()

    # Decouple F padding granularity from TK: pad F to a 512 multiple, then
    # pick (num_k, TK) so num_k * TK >= F_pad with TK near F_pad / num_k.
    # Small F (F_pad <= tk_max) collapses to a single grid step.
    F_pad = _round_up(F, 512)
    num_k = max(1, _cdiv(F_pad, cfg["tk_max"]))
    TK = _round_up(_cdiv(F_pad, num_k), 512)
    F_final = num_k * TK
    TN = FEAT_PAD // cfg["n_split"]

    # Streamed backbone weight: bf16 (halves HBM bytes; MXU-native on
    # v5e/v6e/v7x).  Pad rows/cols are zero -> numerically inert.
    wb_p = jnp.zeros((F_final, FEAT_PAD), jnp.bfloat16)
    wb_p = wb_p.at[:F, :FEAT_DIM].set(params["wb"].astype(jnp.bfloat16))

    bb_p = jnp.zeros((1, FEAT_PAD), jnp.float32).at[:, :FEAT_DIM].set(params["bb"])

    # Head weights: bf16 operands for the two tiny MXU dots; biases stay f32.
    w1_p = jnp.zeros((FEAT_PAD, HID_PAD), jnp.bfloat16)
    w1_p = w1_p.at[:FEAT_DIM, :HID_DIM].set(params["w1"].astype(jnp.bfloat16))
    b1_p = jnp.zeros((1, HID_PAD), jnp.float32).at[:, :HID_DIM].set(params["b1"])
    w2_p = jnp.zeros((HID_PAD, OUT_PAD), jnp.bfloat16)
    w2_p = w2_p.at[:HID_DIM, :NUM_CLASSES].set(params["w2"].astype(jnp.bfloat16))
    b2_p = jnp.zeros((1, OUT_PAD), jnp.float32).at[:, :NUM_CLASSES].set(params["b2"])

    return {
        "wb": wb_p, "bb": bb_p, "w1": w1_p, "b1": b1_p, "w2": w2_p, "b2": b2_p,
        "F": F, "F_final": F_final, "TK": TK, "num_k": num_k,
        "TN": TN, "n_split": cfg["n_split"], "vmem_limit": cfg["vmem_limit"],
    }


# ----------------------------------------------------------------------------
# Forward
# ----------------------------------------------------------------------------

def myresnext50_forward(x_nchw, prepped):
    """x_nchw: (B, C, H, W) float32. Returns (B, 1, NUM_CLASSES), as PyTorch."""
    B = x_nchw.shape[0]
    x_flat = x_nchw.reshape(B, -1)
    assert x_flat.shape[1] == prepped["F"], "input feature dim mismatch"

    F, F_final = prepped["F"], prepped["F_final"]
    TK, num_k = prepped["TK"], prepped["num_k"]
    TN, n_split = prepped["TN"], prepped["n_split"]

    # bf16 packs 16 rows per vreg sublane-wise -> pad batch to 16.
    B_pad = _round_up(B, 16)
    x_p = jnp.zeros((B_pad, F_final), jnp.bfloat16)
    x_p = x_p.at[:B, :F].set(x_flat.astype(jnp.bfloat16))

    # Backbone stand-in: memory-bound bf16 weight stream, f32 accumulation.
    feat = pl.pallas_call(
        backbone_kernel,
        out_shape=jax.ShapeDtypeStruct((B_pad, FEAT_PAD), jnp.float32),
        grid_spec=pltpu.PrefetchScalarGridSpec(
            num_scalar_prefetch=0,
            grid=(n_split, num_k),
            in_specs=[
                pl.BlockSpec((B_pad, TK), lambda j, k: (0, k)),   # x K-tile
                pl.BlockSpec((TK, TN), lambda j, k: (k, j)),      # wb tile
                pl.BlockSpec((1, TN), lambda j, k: (0, j)),       # bias cols
            ],
            out_specs=pl.BlockSpec((B_pad, TN), lambda j, k: (0, j)),
            scratch_shapes=[pltpu.VMEM((B_pad, TN), jnp.float32)],
        ),
        compiler_params=pltpu.CompilerParams(
            # Column split is independent (parallel across TensorCores on
            # v7x); K is the reduction axis.
            dimension_semantics=("parallel", "arbitrary"),
            vmem_limit_bytes=prepped["vmem_limit"],
        ),
    )(x_p, prepped["wb"], prepped["bb"])

    # Tiny head MLP + sigmoid: one-shot pallas_call, whole arrays in VMEM.
    out = pl.pallas_call(
        head_kernel,
        out_shape=jax.ShapeDtypeStruct((B_pad, OUT_PAD), jnp.float32),
    )(feat, prepped["w1"], prepped["b1"], prepped["w2"], prepped["b2"])

    # torch: sigmoid(x.reshape(B, 1, num_classes)); drop batch/class padding.
    return out[:B, :NUM_CLASSES].reshape(B, 1, NUM_CLASSES)


# ----------------------------------------------------------------------------
# Params + reference
# ----------------------------------------------------------------------------

def init_params(key, in_features):
    """Deterministic PyTorch-nn.Linear-style init (uniform +/- 1/sqrt(fan_in))."""
    ks = jax.random.split(key, 6)

    def linear(kw, kb, fan_in, fan_out):
        bound = 1.0 / jnp.sqrt(jnp.float32(fan_in))
        w = jax.random.uniform(kw, (fan_in, fan_out), jnp.float32, -bound, bound)
        b = jax.random.uniform(kb, (1, fan_out), jnp.float32, -bound, bound)
        return w, b

    wb, bb = linear(ks[0], ks[1], in_features, FEAT_DIM)   # backbone stand-in
    w1, b1 = linear(ks[2], ks[3], FEAT_DIM, HID_DIM)       # Linear(1000, 100)
    w2, b2 = linear(ks[4], ks[5], HID_DIM, NUM_CLASSES)    # Linear(100, 3)
    return {"wb": wb, "bb": bb, "w1": w1, "b1": b1, "w2": w2, "b2": b2}


def reference_forward(x_nchw, params):
    """Pure-JAX reference with the same operand dtypes as the kernels."""
    B = x_nchw.shape[0]
    x = x_nchw.reshape(B, -1)
    feat = jnp.dot(x.astype(jnp.bfloat16), params["wb"].astype(jnp.bfloat16),
                   preferred_element_type=jnp.float32) + params["bb"]
    h = jnp.dot(feat.astype(jnp.bfloat16), params["w1"].astype(jnp.bfloat16),
                preferred_element_type=jnp.float32) + params["b1"]
    h = jnp.maximum(h, 0.0)
    logits = jnp.dot(h.astype(jnp.bfloat16), params["w2"].astype(jnp.bfloat16),
                     preferred_element_type=jnp.float32) + params["b2"]
    return jax.nn.sigmoid(logits).reshape(B, 1, NUM_CLASSES)


if __name__ == "__main__":
    key = jax.random.PRNGKey(0)
    k_x, k_p = jax.random.split(key)

    # Small NCHW input consistent with the module's image-input forward.
    B, C, H, W = 2, 4, 16, 16
    x = jax.random.normal(k_x, (B, C, H, W), dtype=jnp.float32)

    params = init_params(k_p, C * H * W)
    prepped = prepare_params(params)          # one-time weight prep (reused)

    out = myresnext50_forward(x, prepped)
    out = jax.block_until_ready(out)

    ref = reference_forward(x, params)
    assert out.shape == (B, 1, NUM_CLASSES), out.shape
    assert jnp.allclose(out, ref, atol=1e-2, rtol=1e-2), "mismatch vs reference"

    print("KERNEL_OK")
</pallas_src>

<mosaic_0001>
module attributes {stable_mosaic.version = 11 : i64} {
  func.func @backbone_kernel(%arg0: i32, %arg1: i32, %arg2: memref<16x1024xbf16, #tpu.memory_space<vmem>>, %arg3: memref<1024x1024xbf16, #tpu.memory_space<vmem>>, %arg4: memref<1x1024xf32, #tpu.memory_space<vmem>>, %arg5: memref<16x1024xf32, #tpu.memory_space<vmem>>, %arg6: memref<16x1024xf32, #tpu.memory_space<vmem>>) attributes {dimension_semantics = [#tpu.dimension_semantics<parallel>, #tpu.dimension_semantics<arbitrary>], iteration_bounds = array<i64: 1, 1>, scalar_prefetch = 0 : i64, scratch_operands = 1 : i64, tpu.core_type = #tpu.core_type<tc>, window_params = [{transform_indices = @transform_0, window_bounds = array<i64: 16, 1024>}, {transform_indices = @transform_1, window_bounds = array<i64: 1024, 1024>}, {transform_indices = @transform_2, window_bounds = array<i64: 1, 1024>}, {transform_indices = @transform_3, window_bounds = array<i64: 16, 1024>}]} {
    %c0_i32 = arith.constant 0 : i32
    %0 = arith.cmpi eq, %arg1, %c0_i32 : i32
    %1 = arith.extui %0 : i1 to i32
    %c0_i32_0 = arith.constant 0 : i32
    %2 = arith.cmpi ne, %1, %c0_i32_0 : i32
    scf.if %2 {
      %cst_10 = arith.constant 0.000000e+00 : f32
      %12 = vector.broadcast %cst_10 : f32 to vector<16x1024xf32>
      %c0_11 = arith.constant 0 : index
      %c0_12 = arith.constant 0 : index
      %13 = vector.load %arg6[%c0_11, %c0_12] : memref<16x1024xf32, #tpu.memory_space<vmem>>, vector<16x1024xf32>
      tpu.vector_store %arg6[%c0_11, %c0_12], %12 {strides = array<i32>} : memref<16x1024xf32, #tpu.memory_space<vmem>>, vector<16x1024xf32>,
    } else {
    }
    %c0 = arith.constant 0 : index
    %c0_1 = arith.constant 0 : index
    %3 = vector.load %arg6[%c0, %c0_1] : memref<16x1024xf32, #tpu.memory_space<vmem>>, vector<16x1024xf32>
    %c0_2 = arith.constant 0 : index
    %c0_3 = arith.constant 0 : index
    %4 = vector.load %arg2[%c0_2, %c0_3] : memref<16x1024xbf16, #tpu.memory_space<vmem>>, vector<16x1024xbf16>
    %c0_4 = arith.constant 0 : index
    %c0_5 = arith.constant 0 : index
    %5 = vector.load %arg3[%c0_4, %c0_5] : memref<1024x1024xbf16, #tpu.memory_space<vmem>>, vector<1024x1024xbf16>
    %cst = arith.constant dense<0.000000e+00> : vector<16x1024xf32>
    %6 = tpu.matmul %4, %5, %cst {dimension_numbers = #tpu.dot_dimension_numbers<[1], [0], [0], [1], [0, 0, 1, 1], [], []>} : vector<16x1024xbf16>, vector<1024x1024xbf16>, vector<16x1024xf32> -> vector<16x1024xf32>
    %7 = arith.addf %3, %6 : vector<16x1024xf32>
    %c0_6 = arith.constant 0 : index
    %c0_7 = arith.constant 0 : index
    %8 = vector.load %arg6[%c0_6, %c0_7] : memref<16x1024xf32, #tpu.memory_space<vmem>>, vector<16x1024xf32>
    tpu.vector_store %arg6[%c0_6, %c0_7], %7 {strides = array<i32>} : memref<16x1024xf32, #tpu.memory_space<vmem>>, vector<16x1024xf32>,
    %c0_i32_8 = arith.constant 0 : i32
    %9 = arith.cmpi eq, %arg1, %c0_i32_8 : i32
    %10 = arith.extui %9 : i1 to i32
    %c0_i32_9 = arith.constant 0 : i32
    %11 = arith.cmpi ne, %10, %c0_i32_9 : i32
    scf.if %11 {
      %c0_10 = arith.constant 0 : index
      %c0_11 = arith.constant 0 : index
      %12 = vector.load %arg6[%c0_10, %c0_11] : memref<16x1024xf32, #tpu.memory_space<vmem>>, vector<16x1024xf32>
      %c0_12 = arith.constant 0 : index
      %c0_13 = arith.constant 0 : index
      %13 = vector.load %arg4[%c0_12, %c0_13] : memref<1x1024xf32, #tpu.memory_space<vmem>>, vector<1x1024xf32>
      %14 = vector.broadcast %13 : vector<1x1024xf32> to vector<16x1024xf32>
      %15 = arith.addf %12, %14 : vector<16x1024xf32>
      %c0_14 = arith.constant 0 : index
      %c0_15 = arith.constant 0 : index
      %16 = vector.load %arg5[%c0_14, %c0_15] : memref<16x1024xf32, #tpu.memory_space<vmem>>, vector<16x1024xf32>
      tpu.vector_store %arg5[%c0_14, %c0_15], %15 {strides = array<i32>} : memref<16x1024xf32, #tpu.memory_space<vmem>>, vector<16x1024xf32>,
    } else {
    }
    return
  }
  func.func @transform_0(%arg0: i32, %arg1: i32) -> (i32, i32) {
    %c0_i32 = arith.constant 0 : i32
    %c0_i32_0 = arith.constant 0 : i32
    return %c0_i32, %arg1 : i32, i32
  }
  func.func @transform_1(%arg0: i32, %arg1: i32) -> (i32, i32) {
    %c0_i32 = arith.constant 0 : i32
    return %arg1, %arg0 : i32, i32
  }
  func.func @transform_2(%arg0: i32, %arg1: i32) -> (i32, i32) {
    %c0_i32 = arith.constant 0 : i32
    %c0_i32_0 = arith.constant 0 : i32
    return %c0_i32, %arg0 : i32, i32
  }
  func.func @transform_3(%arg0: i32, %arg1: i32) -> (i32, i32) {
    %c0_i32 = arith.constant 0 : i32
    %c0_i32_0 = arith.constant 0 : i32
    return %c0_i32, %arg0 : i32, i32
  }
}

</mosaic_0001>

<bundles_post_ra>
// kernel: tpu_custom_call.1
= control target key start
LH: loop header
LB: loop body
LE: loop exit
PB: predicated region body
PF: predicated region fallthrough
CT: control target
= control target key end

     0   :  { %8 = vsyncpa [#allocation4], 0  ;;  %s4894_s0 = inlined_call_operand.hbm [shape: bf16[16,1024], index: 0, kind: input, shape index: {}]   ;;  %s4895_s1 = inlined_call_operand.hbm [shape: bf16[1024,1024], index: 1, kind: input, shape index: {}]   ;;  %s4896_s2 = inlined_call_operand.hbm [shape: f32[1,1024], index: 2, kind: input, shape index: {}]   ;;  %s4897_s3 = inlined_call_operand.hbm [shape: f32[16,1024], index: 3, kind: output, shape index: {}]  }
   0x1   :  { %9 = vsyncpa [#allocation7], 0 }
   0x2   :  { %10 = vsyncpa [#allocation5], 0  ;;  %s4711_s12 = smov [#allocation6]   ;;  %s4712_s14 = smov [#allocation3]  }
   0x3   :  { %s28_s13 = sshll.u32 %s4711_s12, 4  ;;  %s16_s15 = sshll.u32 %s4712_s14, 4  ;;  %s29_s13 = int_to_ptr.vmem [resolvable:$true] %s28_s13  ;;  %s4739_s15 = int_to_ptr.vmem [resolvable:$true] %s16_s15 }
   0x4   :  { %s4617_s18 = scalar_lea.hbm %s4895_s1, 65536 }
   0x5   :  { %p4618_p0 = scmp.ne.s32.totalorder %s4895_s1, %s4617_s18  ;;  %p4621_p1 = scmp.lt.u32.totalorder %s4617_s18, %s4895_s1 }
   0x7   :  { %p4623_p2 = pnand %p4621_p1, %p4618_p0 }
   0x9   :  { %4626 = shalt.err (!%p4623_p2)
}
   0xa   :  { %s4627_s23 = scalar_lea.vmem %s29_s13, 65536  ;;  %p4632_p4 = scmp.lt.s32.totalorder %s29_s13, %s29_s13 }
   0xb   :  { %p4628_p3 = scmp.ne.s32.totalorder %s29_s13, %s4627_s23  ;;  %p4633_p5 = scmp.lt.s32.totalorder %s4627_s23, %s4627_s23 }
   0xd   :  { %p4634_p6 = por %p4633_p5, %p4632_p4 }
   0xf   :  { %p4635_p7 = pnand %p4634_p6, %p4628_p3 }
  0x11   :  { %4638 = shalt.err (!%p4635_p7)
}
  0x12   :  { %s4713_s24 = smov 512   ;;  %s4714_s25 = smov 32  }
  0x13   :  { %34 = dma.hbm_to_vmem [thread:$0]  %s4895_s1, 65536, %s29_s13, [#allocation7], %s4713_s24, %s4713_s24, %s4714_s25  }
  0x14   :  { %s4639_s30 = scalar_lea.hbm %s4894_s0, 1024 }
  0x15   :  { %p4640_p8 = scmp.ne.s32.totalorder %s4894_s0, %s4639_s30  ;;  %p4643_p9 = scmp.lt.u32.totalorder %s4639_s30, %s4894_s0 }
  0x17   :  { %p4645_p10 = pnand %p4643_p9, %p4640_p8 }
  0x19   :  { %4648 = shalt.err (!%p4645_p10)
}
  0x1a   :  { %s4649_s8 = scalar_lea.vmem %s4739_s15, 1024  ;;  %p4654_p12 = scmp.lt.s32.totalorder %s4739_s15, %s4739_s15 }
  0x1b   :  { %p4650_p11 = scmp.ne.s32.totalorder %s4739_s15, %s4649_s8  ;;  %p4655_p13 = scmp.lt.s32.totalorder %s4649_s8, %s4649_s8 }
  0x1d   :  { %p4656_p0 = por %p4655_p13, %p4654_p12 }
  0x1f   :  { %p4657_p1 = pnand %p4656_p0, %p4650_p11 }
  0x21   :  { %4660 = shalt.err (!%p4657_p1)
}
  0x22   :  { %22 = dma.hbm_to_vmem [thread:$0]  %s4894_s0, 1024, %s4739_s15, [#allocation4], %s4713_s24, %s4713_s24, %s4714_s25  }
  0x23   :  { %s4715_s10 = smov [#allocation8]   ;;  %s4661_s14 = scalar_lea.hbm %s4896_s2, 128 }
  0x24   :  { %s41_s11 = sshll.u32 %s4715_s10, 4  ;;  %p4662_p2 = scmp.ne.s32.totalorder %s4896_s2, %s4661_s14  ;;  %s42_s11 = int_to_ptr.vmem [resolvable:$true] %s41_s11 }
  0x25   :  { %p4665_p3 = scmp.lt.u32.totalorder %s4661_s14, %s4896_s2 }
  0x27   :  { %p4667_p4 = pnand %p4665_p3, %p4662_p2 }
  0x29   :  { %4670 = shalt.err (!%p4667_p4)
}
  0x2a   :  { %s4671_s20 = scalar_lea.vmem %s42_s11, 128  ;;  %p4676_p6 = scmp.lt.s32.totalorder %s42_s11, %s42_s11 }
  0x2b   :  { %p4672_p5 = scmp.ne.s32.totalorder %s42_s11, %s4671_s20  ;;  %p4677_p7 = scmp.lt.s32.totalorder %s4671_s20, %s4671_s20 }
  0x2d   :  { %p4678_p8 = por %p4677_p7, %p4676_p6 }
  0x2f   :  { %p4679_p9 = pnand %p4678_p8, %p4672_p5 }
  0x31   :  { %4682 = shalt.err (!%p4679_p9)
}
  0x32   :  { %44 = dma.hbm_to_vmem [thread:$0]  %s4896_s2, 128, %s42_s11, [#allocation7]  }
  0x33   :  { %4705 = dma.done.wait [#allocation4], 1024  }
  0x34   :  { %4706 = vsyncadd [#allocation4], 4294966272 }
  0x35   :  { %4707 = dma.done.wait [#allocation7], 65664  }
  0x36   :  { %4708 = vsyncadd [#allocation7], 4294901632  ;;  %v98_v0 = vld [vmem:[#allocation6] sm:$0xff]  ;;  %v99_v2 = vld [vmem:[#allocation6 + $0x8] sm:$0xff]  ;;  %s4716_s2 = smov [#allocation9]  }
  0x37   :  { %v102_v1 = vld [vmem:[#allocation6 + $0x20] sm:$0xff]  ;;  %v103_v4 = vld [vmem:[#allocation6 + $0x28] sm:$0xff]  ;;  %s4028_s21 = sshll.u32 %s4716_s2, 4  ;;  %s4029_s21 = int_to_ptr.vmem [resolvable:$true] %s4028_s21 }
  0x38   :  { %v4050_v3 = vcombine.high %v98_v0, %v102_v1  ;;  %v4049_v5 = vcombine.low %v98_v0, %v102_v1  ;;  %v106_v6 = vld [vmem:[#allocation6 + $0x40] sm:$0xff]  ;;  %v4052_v8 = vcombine.high %v99_v2, %v103_v4  ;;  %v4051_v9 = vcombine.low %v99_v2, %v103_v4  ;;  %v107_v11 = vld [vmem:[#allocation6 + $0x48] sm:$0xff]  ;;  %s4683_s22 = scalar_lea.vmem %s4029_s21, 2048  ;;  %p4688_p11 = scmp.lt.s32.totalorder %s4029_s21, %s4029_s21 }
  0x39   :  { %v110_v7 = vld [vmem:[#allocation6 + $0x60] sm:$0xff]  ;;  %v111_v12 = vld [vmem:[#allocation6 + $0x68] sm:$0xff]  ;;  %p4684_p10 = scmp.ne.s32.totalorder %s4029_s21, %s4683_s22  ;;  %p4689_p12 = scmp.lt.s32.totalorder %s4683_s22, %s4683_s22 }
  0x3a   :  { %v4058_v10 = vcombine.high %v106_v6, %v110_v7  ;;  %v114_v13 = vld [vmem:[#allocation6 + $0x80] sm:$0xff]  ;;  %3210 = vmatprep.subr.bf16.mxu0 %v4050_v3  ;;  %v4060_v14 = vcombine.high %v107_v11, %v111_v12  ;;  %v115_v16 = vld [vmem:[#allocation6 + $0x88] sm:$0xff]  ;;  %3382 = vmatprep.subr.bf16.mxu1 %v4052_v8  ;;  %v4057_v18 = vcombine.low %v106_v6, %v110_v7 }
  0x3b   :  { %v118_v15 = vld [vmem:[#allocation6 + $0xa0] sm:$0xff]  ;;  %v119_v17 = vld [vmem:[#allocation6 + $0xa8] sm:$0xff]  ;;  %3211 = vmatpush1.bf16.msra.mxu0 %v4049_v5  ;;  %3383 = vmatpush1.bf16.msra.mxu1 %v4051_v9  ;;  %v4059_v19 = vcombine.low %v107_v11, %v111_v12  ;;  %p4690_p13 = por %p4689_p12, %p4688_p11 }
  0x3c   :  { %3212 = vmatprep.subr.bf16.mxu0 %v4058_v10  ;;  %v4066_v20 = vcombine.high %v114_v13, %v118_v15  ;;  %3384 = vmatprep.subr.bf16.mxu1 %v4060_v14  ;;  %v4068_v21 = vcombine.high %v115_v16, %v119_v17  ;;  %v122_v22 = vld [vmem:[#allocation6 + $0xc0] sm:$0xff]  ;;  %v123_v24 = vld [vmem:[#allocation6 + $0xc8] sm:$0xff]  ;;  %v4065_v26 = vcombine.low %v114_v13, %v118_v15 }
  0x3d   :  { %v126_v23 = vld [vmem:[#allocation6 + $0xe0] sm:$0xff]  ;;  %v127_v25 = vld [vmem:[#allocation6 + $0xe8] sm:$0xff]  ;;  %v4067_v27 = vcombine.low %v115_v16, %v119_v17  ;;  %p4691_p0 = pnand %p4690_p13, %p4684_p10 }
  0x3e   :  { %v4074_v28 = vcombine.high %v122_v22, %v126_v23  ;;  %v4076_v29 = vcombine.high %v123_v24, %v127_v25  ;;  %v130_v30 = vld [vmem:[#allocation6 + $0x100] sm:$0xff]  ;;  %v131_v32 = vld [vmem:[#allocation6 + $0x108] sm:$0xff]  ;;  %v4073_v34 = vcombine.low %v122_v22, %v126_v23  ;;  %v4075_v35 = vcombine.low %v123_v24, %v127_v25 }
  0x3f   :  { %3213 = vmatpush1.bf16.msra.mxu0 %v4057_v18  ;;  %3385 = vmatpush1.bf16.msra.mxu1 %v4059_v19  ;;  %v134_v31 = vld [vmem:[#allocation6 + $0x120] sm:$0xff]  ;;  %v135_v33 = vld [vmem:[#allocation6 + $0x128] sm:$0xff] }
  0x40   :  { %3214 = vmatprep.subr.bf16.mxu0 %v4066_v20  ;;  %3386 = vmatprep.subr.bf16.mxu1 %v4068_v21  ;;  %v4082_v36 = vcombine.high %v130_v30, %v134_v31  ;;  %v4084_v37 = vcombine.high %v131_v32, %v135_v33  ;;  %v138_v38 = vld [vmem:[#allocation6 + $0x140] sm:$0xff]  ;;  %v139_v40 = vld [vmem:[#allocation6 + $0x148] sm:$0xff]  ;;  %v4081_v42 = vcombine.low %v130_v30, %v134_v31 }
  0x41   :  { %v142_v39 = vld [vmem:[#allocation6 + $0x160] sm:$0xff]  ;;  %v143_v41 = vld [vmem:[#allocation6 + $0x168] sm:$0xff]  ;;  %v4083_v43 = vcombine.low %v131_v32, %v135_v33 }
  0x42   :  { %v4090_v44 = vcombine.high %v138_v38, %v142_v39  ;;  %v4092_v45 = vcombine.high %v139_v40, %v143_v41  ;;  %v146_v46 = vld [vmem:[#allocation6 + $0x180] sm:$0xff]  ;;  %v147_v48 = vld [vmem:[#allocation6 + $0x188] sm:$0xff]  ;;  %v4089_v50 = vcombine.low %v138_v38, %v142_v39  ;;  %v4091_v51 = vcombine.low %v139_v40, %v143_v41 }
  0x43   :  { %3215 = vmatpush1.bf16.msra.mxu0 %v4065_v26  ;;  %3387 = vmatpush1.bf16.msra.mxu1 %v4067_v27  ;;  %v150_v47 = vld [vmem:[#allocation6 + $0x1a0] sm:$0xff]  ;;  %v151_v49 = vld [vmem:[#allocation6 + $0x1a8] sm:$0xff] }
  0x44   :  { %3216 = vmatprep.subr.bf16.mxu0 %v4074_v28  ;;  %3388 = vmatprep.subr.bf16.mxu1 %v4076_v29  ;;  %v4098_v52 = vcombine.high %v146_v46, %v150_v47  ;;  %v4782_v53 = vld [vmem:[#allocation3] sm:$0xff]  ;;  %v4100_v55 = vcombine.high %v147_v48, %v151_v49  ;;  %v155_v59 = vld [vmem:[#allocation6 + $0x1c8] sm:$0xff]  ;;  %v4097_v61 = vcombine.low %v146_v46, %v150_v47 }
  0x45   :  { %v4784_v54 = vld [vmem:[#allocation3 + $0x20] sm:$0xff]  ;;  %v159_v60 = vld [vmem:[#allocation6 + $0x1e8] sm:$0xff]  ;;  %v4099_v62 = vcombine.low %v147_v48, %v151_v49 }
  0x46   :  { %v154_v56 = vld [vmem:[#allocation6 + $0x1c0] sm:$0xff]  ;;  %v4788_v58 = vcombine.high %v4782_v53, %v4784_v54  ;;  %v4108_v0 = vcombine.high %v155_v59, %v159_v60  ;;  %v163_v3 = vld [vmem:[#allocation6 + $0x208] sm:$0xff]  ;;  %v4107_v6 = vcombine.low %v155_v59, %v159_v60 }
  0x47   :  { %3217 = vmatpush1.bf16.msra.mxu0 %v4073_v34  ;;  %3389 = vmatpush1.bf16.msra.mxu1 %v4075_v35  ;;  %v158_v57 = vld [vmem:[#allocation6 + $0x1e0] sm:$0xff]  ;;  %v167_v4 = vld [vmem:[#allocation6 + $0x228] sm:$0xff] }
  0x48   :  { %3218 = vmatprep.subr.bf16.mxu0 %v4082_v36  ;;  %3390 = vmatprep.subr.bf16.mxu1 %v4084_v37  ;;  %v4106_v63 = vcombine.high %v154_v56, %v158_v57  ;;  %v162_v1 = vld [vmem:[#allocation6 + $0x200] sm:$0xff]  ;;  %v4105_v5 = vcombine.low %v154_v56, %v158_v57  ;;  %v4116_v8 = vcombine.high %v163_v3, %v167_v4  ;;  %v171_v11 = vld [vmem:[#allocation6 + $0x248] sm:$0xff] }
  0x49   :  { %3242 = vmatprep.mubr.bf16.mxu0 %v4788_v58  ;;  %v166_v2 = vld [vmem:[#allocation6 + $0x220] sm:$0xff]  ;;  %3414 = vmatprep.mubr.bf16.mxu1 %v4788_v58  ;;  %v175_v12 = vld [vmem:[#allocation6 + $0x268] sm:$0xff]  ;;  %v4115_v14 = vcombine.low %v163_v3, %v167_v4 }
  0x4a   :  { %v4114_v7 = vcombine.high %v162_v1, %v166_v2  ;;  %v170_v9 = vld [vmem:[#allocation6 + $0x240] sm:$0xff]  ;;  %v4113_v13 = vcombine.low %v162_v1, %v166_v2  ;;  %v4124_v16 = vcombine.high %v171_v11, %v175_v12  ;;  %v179_v19 = vld [vmem:[#allocation6 + $0x288] sm:$0xff]  ;;  %v4123_v22 = vcombine.low %v171_v11, %v175_v12 }
  0x4b   :  { %3219 = vmatpush1.bf16.msra.mxu0 %v4081_v42  ;;  %3391 = vmatpush1.bf16.msra.mxu1 %v4083_v43  ;;  %v174_v10 = vld [vmem:[#allocation6 + $0x260] sm:$0xff]  ;;  %v183_v20 = vld [vmem:[#allocation6 + $0x2a8] sm:$0xff] }
  0x4c   :  { %3220 = vmatprep.subr.bf16.mxu0 %v4090_v44  ;;  %3392 = vmatprep.subr.bf16.mxu1 %v4092_v45  ;;  %v4122_v15 = vcombine.high %v170_v9, %v174_v10  ;;  %v178_v17 = vld [vmem:[#allocation6 + $0x280] sm:$0xff]  ;;  %v4121_v21 = vcombine.low %v170_v9, %v174_v10  ;;  %v4132_v24 = vcombine.high %v179_v19, %v183_v20  ;;  %v187_v27 = vld [vmem:[#allocation6 + $0x2c8] sm:$0xff] }
  0x4d   :  { %v182_v18 = vld [vmem:[#allocation6 + $0x2a0] sm:$0xff]  ;;  %v191_v28 = vld [vmem:[#allocation6 + $0x2e8] sm:$0xff]  ;;  %v4131_v30 = vcombine.low %v179_v19, %v183_v20 }
  0x4e   :  { %v4130_v23 = vcombine.high %v178_v17, %v182_v18  ;;  %v186_v25 = vld [vmem:[#allocation6 + $0x2c0] sm:$0xff]  ;;  %v4129_v29 = vcombine.low %v178_v17, %v182_v18  ;;  %v4140_v32 = vcombine.high %v187_v27, %v191_v28  ;;  %v195_v35 = vld [vmem:[#allocation6 + $0x308] sm:$0xff]  ;;  %v4139_v38 = vcombine.low %v187_v27, %v191_v28 }
  0x4f   :  { %3221 = vmatpush1.bf16.msra.mxu0 %v4089_v50  ;;  %3393 = vmatpush1.bf16.msra.mxu1 %v4091_v51  ;;  %v190_v26 = vld [vmem:[#allocation6 + $0x2e0] sm:$0xff]  ;;  %v199_v36 = vld [vmem:[#allocation6 + $0x328] sm:$0xff] }
  0x50   :  { %3222 = vmatprep.subr.bf16.mxu0 %v4098_v52  ;;  %3394 = vmatprep.subr.bf16.mxu1 %v4100_v55  ;;  %v4138_v31 = vcombine.high %v186_v25, %v190_v26  ;;  %v194_v33 = vld [vmem:[#allocation6 + $0x300] sm:$0xff]  ;;  %v4137_v37 = vcombine.low %v186_v25, %v190_v26  ;;  %v4148_v40 = vcombine.high %v195_v35, %v199_v36  ;;  %v203_v43 = vld [vmem:[#allocation6 + $0x348] sm:$0xff] }
  0x51   :  { %v198_v34 = vld [vmem:[#allocation6 + $0x320] sm:$0xff]  ;;  %v207_v44 = vld [vmem:[#allocation6 + $0x368] sm:$0xff]  ;;  %v4147_v46 = vcombine.low %v195_v35, %v199_v36 }
  0x52   :  { %v4146_v39 = vcombine.high %v194_v33, %v198_v34  ;;  %v202_v41 = vld [vmem:[#allocation6 + $0x340] sm:$0xff]  ;;  %v4145_v45 = vcombine.low %v194_v33, %v198_v34  ;;  %v4156_v48 = vcombine.high %v203_v43, %v207_v44  ;;  %v211_v51 = vld [vmem:[#allocation6 + $0x388] sm:$0xff]  ;;  %v4155_v56 = vcombine.low %v203_v43, %v207_v44 }
  0x53   :  { %3223 = vmatpush1.bf16.msra.mxu0 %v4097_v61  ;;  %3395 = vmatpush1.bf16.msra.mxu1 %v4099_v62  ;;  %v206_v42 = vld [vmem:[#allocation6 + $0x360] sm:$0xff]  ;;  %v215_v52 = vld [vmem:[#allocation6 + $0x3a8] sm:$0xff] }
  0x54   :  { %3224 = vmatprep.subr.bf16.mxu0 %v4106_v63  ;;  %3396 = vmatprep.subr.bf16.mxu1 %v4108_v0  ;;  %v4154_v47 = vcombine.high %v202_v41, %v206_v42  ;;  %v210_v49 = vld [vmem:[#allocation6 + $0x380] sm:$0xff]  ;;  %v4153_v55 = vcombine.low %v202_v41, %v206_v42  ;;  %v4164_v59 = vcombine.high %v211_v51, %v215_v52  ;;  %v219_v62 = vld [vmem:[#allocation6 + $0x3c8] sm:$0xff] }
  0x55   :  { %v214_v50 = vld [vmem:[#allocation6 + $0x3a0] sm:$0xff]  ;;  %v223_v63 = vld [vmem:[#allocation6 + $0x3e8] sm:$0xff]  ;;  %v4163_v1 = vcombine.low %v211_v51, %v215_v52 }
  0x56   :  { %v4162_v57 = vcombine.high %v210_v49, %v214_v50  ;;  %v218_v60 = vld [vmem:[#allocation6 + $0x3c0] sm:$0xff]  ;;  %v4161_v0 = vcombine.low %v210_v49, %v214_v50  ;;  %v4172_v3 = vcombine.high %v219_v62, %v223_v63  ;;  %v4171_v9 = vcombine.low %v219_v62, %v223_v63  ;;  %v4796_v17 = vld [vmem:[#allocation3 + $0x8] sm:$0xff] }
  0x57   :  { %3225 = vmatpush1.bf16.msra.mxu0 %v4105_v5  ;;  %3397 = vmatpush1.bf16.msra.mxu1 %v4107_v6  ;;  %v222_v61 = vld [vmem:[#allocation6 + $0x3e0] sm:$0xff]  ;;  %v227_v6 = vld [vmem:[#allocation6 + $0x408] sm:$0xff] }
  0x58   :  { %3226 = vmatprep.subr.bf16.mxu0 %v4114_v7  ;;  %3398 = vmatprep.subr.bf16.mxu1 %v4116_v8  ;;  %v4170_v2 = vcombine.high %v218_v60, %v222_v61  ;;  %v226_v4 = vld [vmem:[#allocation6 + $0x400] sm:$0xff]  ;;  %v231_v7 = vld [vmem:[#allocation6 + $0x428] sm:$0xff]  ;;  %v4169_v8 = vcombine.low %v218_v60, %v222_v61 }
  0x59   :  { %v230_v5 = vld [vmem:[#allocation6 + $0x420] sm:$0xff]  ;;  %v4180_v11 = vcombine.high %v227_v6, %v231_v7  ;;  %v4798_v18 = vld [vmem:[#allocation3 + $0x28] sm:$0xff]  ;;  %v4179_v20 = vcombine.low %v227_v6, %v231_v7 }
  0x5a   :  { %v4178_v10 = vcombine.high %v226_v4, %v230_v5  ;;  %v234_v12 = vld [vmem:[#allocation6 + $0x440] sm:$0xff]  ;;  %v4177_v19 = vcombine.low %v226_v4, %v230_v5  ;;  %v4802_v25 = vcombine.high %v4796_v17, %v4798_v18  ;;  %v255_v33 = vld [vmem:[#allocation6 + $0x4e8] sm:$0xff] }
  0x5b   :  { %3227 = vmatpush1.bf16.msra.mxu0 %v4113_v13  ;;  %3399 = vmatpush1.bf16.msra.mxu1 %v4115_v14  ;;  %v238_v13 = vld [vmem:[#allocation6 + $0x460] sm:$0xff]  ;;  %v235_v14 = vld [vmem:[#allocation6 + $0x448] sm:$0xff] }
  0x5c   :  { %3228 = vmatprep.subr.bf16.mxu0 %v4122_v15  ;;  %3400 = vmatprep.subr.bf16.mxu1 %v4124_v16  ;;  %v4794_v15 = vcombine.low %v4782_v53, %v4784_v54  ;;  %v239_v16 = vld [vmem:[#allocation6 + $0x468] sm:$0xff]  ;;  %v4185_v26 = vcombine.low %v234_v12, %v238_v13 }
  0x5d   :  { %v243_v53 = vld [vmem:[#allocation6 + $0x488] sm:$0xff]  ;;  %v4187_v27 = vcombine.low %v235_v14, %v239_v16 }
  0x5e   :  { %v247_v54 = vld [vmem:[#allocation6 + $0x4a8] sm:$0xff] }
  0x5f   :  { %3229 = vmatpush1.bf16.msra.mxu0 %v4121_v21  ;;  %3401 = vmatpush1.bf16.msra.mxu1 %v4123_v22  ;;  %v4186_v21 = vcombine.high %v234_v12, %v238_v13  ;;  %v4188_v22 = vcombine.high %v235_v14, %v239_v16  ;;  %v4195_v35 = vcombine.low %v243_v53, %v247_v54  ;;  %v263_v41 = vld [vmem:[#allocation6 + $0x528] sm:$0xff] }
  0x60   :  { %3230 = vmatprep.subr.bf16.mxu0 %v4130_v23  ;;  %3402 = vmatprep.subr.bf16.mxu1 %v4132_v24  ;;  %v242_v23 = vld [vmem:[#allocation6 + $0x480] sm:$0xff]  ;;  %v271_v49 = vld [vmem:[#allocation6 + $0x568] sm:$0xff] }
  0x61   :  { %v246_v24 = vld [vmem:[#allocation6 + $0x4a0] sm:$0xff]  ;;  %v279_v60 = vld [vmem:[#allocation6 + $0x5a8] sm:$0xff] }
  0x62   :  { %v4194_v28 = vcombine.high %v242_v23, %v246_v24  ;;  %v4193_v34 = vcombine.low %v242_v23, %v246_v24  ;;  %v287_v4 = vld [vmem:[#allocation6 + $0x5e8] sm:$0xff] }
  0x63   :  { %3231 = vmatpush1.bf16.msra.mxu0 %v4129_v29  ;;  %3403 = vmatpush1.bf16.msra.mxu1 %v4131_v30  ;;  %v4196_v29 = vcombine.high %v243_v53, %v247_v54  ;;  %v250_v30 = vld [vmem:[#allocation6 + $0x4c0] sm:$0xff]  ;;  %v295_v12 = vld [vmem:[#allocation6 + $0x628] sm:$0xff] }
  0x64   :  { %3232 = vmatprep.subr.bf16.mxu0 %v4138_v31  ;;  %3404 = vmatprep.subr.bf16.mxu1 %v4140_v32  ;;  %v254_v31 = vld [vmem:[#allocation6 + $0x4e0] sm:$0xff]  ;;  %v251_v32 = vld [vmem:[#allocation6 + $0x4c8] sm:$0xff] }
  0x65   :  { %v4202_v36 = vcombine.high %v250_v30, %v254_v31  ;;  %v4201_v42 = vcombine.low %v250_v30, %v254_v31  ;;  %v4203_v43 = vcombine.low %v251_v32, %v255_v33  ;;  %v303_v23 = vld [vmem:[#allocation6 + $0x668] sm:$0xff] }
  0x66   :  { %v311_v30 = vld [vmem:[#allocation6 + $0x6a8] sm:$0xff] }
  0x67   :  { %3233 = vmatpush1.bf16.msra.mxu0 %v4137_v37  ;;  %3405 = vmatpush1.bf16.msra.mxu1 %v4139_v38  ;;  %v4204_v37 = vcombine.high %v251_v32, %v255_v33  ;;  %v258_v38 = vld [vmem:[#allocation6 + $0x500] sm:$0xff] }
  0x68   :  { %3234 = vmatprep.subr.bf16.mxu0 %v4146_v39  ;;  %3406 = vmatprep.subr.bf16.mxu1 %v4148_v40  ;;  %v262_v39 = vld [vmem:[#allocation6 + $0x520] sm:$0xff]  ;;  %v259_v40 = vld [vmem:[#allocation6 + $0x508] sm:$0xff] }
  0x69   :  { %v4210_v44 = vcombine.high %v258_v38, %v262_v39  ;;  %v4209_v50 = vcombine.low %v258_v38, %v262_v39  ;;  %v4211_v51 = vcombine.low %v259_v40, %v263_v41  ;;  %v319_v38 = vld [vmem:[#allocation6 + $0x6e8] sm:$0xff] }
  0x6b   :  { %3235 = vmatpush1.bf16.msra.mxu0 %v4145_v45  ;;  %3407 = vmatpush1.bf16.msra.mxu1 %v4147_v46  ;;  %v4212_v45 = vcombine.high %v259_v40, %v263_v41  ;;  %v266_v46 = vld [vmem:[#allocation6 + $0x540] sm:$0xff] }
  0x6c   :  { %3236 = vmatprep.subr.bf16.mxu0 %v4154_v47  ;;  %3408 = vmatprep.subr.bf16.mxu1 %v4156_v48  ;;  %v270_v47 = vld [vmem:[#allocation6 + $0x560] sm:$0xff]  ;;  %v267_v48 = vld [vmem:[#allocation6 + $0x548] sm:$0xff] }
  0x6d   :  { %v4218_v52 = vcombine.high %v266_v46, %v270_v47  ;;  %v4217_v61 = vcombine.low %v266_v46, %v270_v47  ;;  %v4219_v62 = vcombine.low %v267_v48, %v271_v49  ;;  %v327_v46 = vld [vmem:[#allocation6 + $0x728] sm:$0xff] }
  0x6f   :  { %3237 = vmatpush1.bf16.msra.mxu0 %v4153_v55  ;;  %3409 = vmatpush1.bf16.msra.mxu1 %v4155_v56  ;;  %v4220_v55 = vcombine.high %v267_v48, %v271_v49  ;;  %v274_v56 = vld [vmem:[#allocation6 + $0x580] sm:$0xff] }
  0x70   :  { %3238 = vmatprep.subr.bf16.mxu0 %v4162_v57  ;;  %3410 = vmatprep.subr.bf16.mxu1 %v4164_v59  ;;  %v278_v57 = vld [vmem:[#allocation6 + $0x5a0] sm:$0xff]  ;;  %v275_v59 = vld [vmem:[#allocation6 + $0x588] sm:$0xff] }
  0x71   :  { %v4226_v63 = vcombine.high %v274_v56, %v278_v57  ;;  %v4225_v5 = vcombine.low %v274_v56, %v278_v57  ;;  %v4227_v6 = vcombine.low %v275_v59, %v279_v60  ;;  %v335_v56 = vld [vmem:[#allocation6 + $0x768] sm:$0xff] }
  0x73   :  { %3239 = vmatpush1.bf16.msra.mxu0 %v4161_v0  ;;  %3411 = vmatpush1.bf16.msra.mxu1 %v4163_v1  ;;  %v4228_v0 = vcombine.high %v275_v59, %v279_v60  ;;  %v282_v1 = vld [vmem:[#allocation6 + $0x5c0] sm:$0xff] }
  0x74   :  { %3240 = vmatprep.subr.bf16.mxu0 %v4170_v2  ;;  %3412 = vmatprep.subr.bf16.mxu1 %v4172_v3  ;;  %v286_v2 = vld [vmem:[#allocation6 + $0x5e0] sm:$0xff]  ;;  %v283_v3 = vld [vmem:[#allocation6 + $0x5c8] sm:$0xff] }
  0x75   :  { %v4234_v7 = vcombine.high %v282_v1, %v286_v2  ;;  %v4233_v13 = vcombine.low %v282_v1, %v286_v2  ;;  %v4235_v14 = vcombine.low %v283_v3, %v287_v4  ;;  %v343_v1 = vld [vmem:[#allocation6 + $0x7a8] sm:$0xff] }
  0x77   :  { %3241 = vmatpush1.bf16.msra.mxu0 %v4169_v8  ;;  %3413 = vmatpush1.bf16.msra.mxu1 %v4171_v9  ;;  %v4236_v8 = vcombine.high %v283_v3, %v287_v4  ;;  %v290_v9 = vld [vmem:[#allocation6 + $0x600] sm:$0xff] }
  0x78   :  { %3253 = vmatprep.subr.bf16.mxu0 %v4178_v10  ;;  %3425 = vmatprep.subr.bf16.mxu1 %v4180_v11  ;;  %v294_v10 = vld [vmem:[#allocation6 + $0x620] sm:$0xff]  ;;  %v291_v11 = vld [vmem:[#allocation6 + $0x608] sm:$0xff] }
  0x79   :  { %v4242_v16 = vcombine.high %v290_v9, %v294_v10  ;;  %v4241_v24 = vcombine.low %v290_v9, %v294_v10  ;;  %v4243_v53 = vcombine.low %v291_v11, %v295_v12  ;;  %v351_v9 = vld [vmem:[#allocation6 + $0x7e8] sm:$0xff] }
  0x7a   :  { %3243 = vmatmul.mubr.bf16.vlgmr.msra.gmra.mrb[0].mxu0 %v4794_v15  ;;  %3415 = vmatmul.mubr.bf16.vlgmr.msra.gmra.mrb[0].mxu1 %v4794_v15 }
  0x7b   :  { %3254 = vmatpush1.bf16.msra.mxu0 %v4177_v19  ;;  %3426 = vmatpush1.bf16.msra.mxu1 %v4179_v20  ;;  %v4244_v19 = vcombine.high %v291_v11, %v295_v12  ;;  %v298_v20 = vld [vmem:[#allocation6 + $0x640] sm:$0xff] }
  0x7c   :  { %3255 = vmatprep.subr.bf16.mxu0 %v4186_v21  ;;  %3427 = vmatprep.subr.bf16.mxu1 %v4188_v22  ;;  %v302_v21 = vld [vmem:[#allocation6 + $0x660] sm:$0xff]  ;;  %v299_v22 = vld [vmem:[#allocation6 + $0x648] sm:$0xff] }
  0x7d   :  { %3285 = vmatprep.mubr.bf16.mxu0 %v4802_v25  ;;  %3457 = vmatprep.mubr.bf16.mxu1 %v4802_v25  ;;  %v4250_v54 = vcombine.high %v298_v20, %v302_v21  ;;  %v4249_v31 = vcombine.low %v298_v20, %v302_v21  ;;  %v4251_v32 = vcombine.low %v299_v22, %v303_v23  ;;  %v359_v20 = vld [vmem:[#allocation6 + $0x828] sm:$0xff] }
  0x7f   :  { %3256 = vmatpush1.bf16.msra.mxu0 %v4185_v26  ;;  %3428 = vmatpush1.bf16.msra.mxu1 %v4187_v27  ;;  %v4252_v26 = vcombine.high %v299_v22, %v303_v23  ;;  %v306_v27 = vld [vmem:[#allocation6 + $0x680] sm:$0xff] }
  0x80   :  { %3257 = vmatprep.subr.bf16.mxu0 %v4194_v28  ;;  %3429 = vmatprep.subr.bf16.mxu1 %v4196_v29  ;;  %v310_v28 = vld [vmem:[#allocation6 + $0x6a0] sm:$0xff]  ;;  %v307_v29 = vld [vmem:[#allocation6 + $0x688] sm:$0xff] }
  0x81   :  { %v4258_v33 = vcombine.high %v306_v27, %v310_v28  ;;  %v4257_v39 = vcombine.low %v306_v27, %v310_v28  ;;  %v4259_v40 = vcombine.low %v307_v29, %v311_v30  ;;  %v4810_v27 = vcombine.low %v4796_v17, %v4798_v18  ;;  %v367_v28 = vld [vmem:[#allocation6 + $0x868] sm:$0xff] }
  0x82   :  { %v371_v17 = vld [vmem:[#allocation6 + $0x888] sm:$0xff] }
  0x83   :  { %3258 = vmatpush1.bf16.msra.mxu0 %v4193_v34  ;;  %3430 = vmatpush1.bf16.msra.mxu1 %v4195_v35  ;;  %v4260_v34 = vcombine.high %v307_v29, %v311_v30  ;;  %v314_v35 = vld [vmem:[#allocation6 + $0x6c0] sm:$0xff]  ;;  %v4812_v29 = vld [vmem:[#allocation3 + $0x10] sm:$0xff]  ;;  %v375_v18 = vld [vmem:[#allocation6 + $0x8a8] sm:$0xff] }
  0x84   :  { %3259 = vmatprep.subr.bf16.mxu0 %v4202_v36  ;;  %3431 = vmatprep.subr.bf16.mxu1 %v4204_v37  ;;  %v318_v36 = vld [vmem:[#allocation6 + $0x6e0] sm:$0xff]  ;;  %v315_v37 = vld [vmem:[#allocation6 + $0x6c8] sm:$0xff]  ;;  %v4814_v30 = vld [vmem:[#allocation3 + $0x30] sm:$0xff] }
  0x85   :  { %v4266_v41 = vcombine.high %v314_v35, %v318_v36  ;;  %v4265_v47 = vcombine.low %v314_v35, %v318_v36  ;;  %v4267_v48 = vcombine.low %v315_v37, %v319_v38  ;;  %v370_v35 = vld [vmem:[#allocation6 + $0x880] sm:$0xff] }
  0x86   :  { %v374_v36 = vld [vmem:[#allocation6 + $0x8a0] sm:$0xff] }
  0x87   :  { %3260 = vmatpush1.bf16.msra.mxu0 %v4201_v42  ;;  %3432 = vmatpush1.bf16.msra.mxu1 %v4203_v43  ;;  %v4268_v42 = vcombine.high %v315_v37, %v319_v38  ;;  %v322_v43 = vld [vmem:[#allocation6 + $0x700] sm:$0xff]  ;;  %v4818_v37 = vcombine.high %v4812_v29, %v4814_v30 }
  0x88   :  { %3261 = vmatprep.subr.bf16.mxu0 %v4210_v44  ;;  %3433 = vmatprep.subr.bf16.mxu1 %v4212_v45  ;;  %v326_v44 = vld [vmem:[#allocation6 + $0x720] sm:$0xff]  ;;  %v323_v45 = vld [vmem:[#allocation6 + $0x708] sm:$0xff] }
  0x89   :  { %v4274_v49 = vcombine.high %v322_v43, %v326_v44  ;;  %v4273_v57 = vcombine.low %v322_v43, %v326_v44  ;;  %v4275_v59 = vcombine.low %v323_v45, %v327_v46  ;;  %v382_v43 = vld [vmem:[#allocation6 + $0x8e0] sm:$0xff]  ;;  %v379_v44 = vld [vmem:[#allocation6 + $0x8c8] sm:$0xff] }
  0x8b   :  { %3262 = vmatpush1.bf16.msra.mxu0 %v4209_v50  ;;  %3434 = vmatpush1.bf16.msra.mxu1 %v4211_v51  ;;  %v4276_v50 = vcombine.high %v323_v45, %v327_v46  ;;  %v330_v51 = vld [vmem:[#allocation6 + $0x740] sm:$0xff]  ;;  %v383_v45 = vld [vmem:[#allocation6 + $0x8e8] sm:$0xff]  ;;  %v4321_v46 = vcombine.low %v370_v35, %v374_v36 }
  0x8c   :  { %3263 = vmatprep.subr.bf16.mxu0 %v4218_v52  ;;  %3435 = vmatprep.subr.bf16.mxu1 %v4220_v55  ;;  %v334_v52 = vld [vmem:[#allocation6 + $0x760] sm:$0xff]  ;;  %v331_v55 = vld [vmem:[#allocation6 + $0x748] sm:$0xff] }
  0x8d   :  { %v4282_v60 = vcombine.high %v330_v51, %v334_v52  ;;  %v4281_v2 = vcombine.low %v330_v51, %v334_v52  ;;  %v4283_v3 = vcombine.low %v331_v55, %v335_v56  ;;  %v390_v51 = vld [vmem:[#allocation6 + $0x920] sm:$0xff]  ;;  %v387_v52 = vld [vmem:[#allocation6 + $0x908] sm:$0xff] }
  0x8f   :  { %3264 = vmatpush1.bf16.msra.mxu0 %v4217_v61  ;;  %3436 = vmatpush1.bf16.msra.mxu1 %v4219_v62  ;;  %v4284_v61 = vcombine.high %v331_v55, %v335_v56  ;;  %v338_v62 = vld [vmem:[#allocation6 + $0x780] sm:$0xff]  ;;  %v391_v55 = vld [vmem:[#allocation6 + $0x928] sm:$0xff] }
  0x90   :  { %3265 = vmatprep.subr.bf16.mxu0 %v4226_v63  ;;  %3437 = vmatprep.subr.bf16.mxu1 %v4228_v0  ;;  %v342_v63 = vld [vmem:[#allocation6 + $0x7a0] sm:$0xff]  ;;  %v339_v0 = vld [vmem:[#allocation6 + $0x788] sm:$0xff] }
  0x91   :  { %v4290_v4 = vcombine.high %v338_v62, %v342_v63  ;;  %v4289_v10 = vcombine.low %v338_v62, %v342_v63  ;;  %v4291_v11 = vcombine.low %v339_v0, %v343_v1  ;;  %v398_v62 = vld [vmem:[#allocation6 + $0x960] sm:$0xff]  ;;  %v395_v63 = vld [vmem:[#allocation6 + $0x948] sm:$0xff] }
  0x93   :  { %3266 = vmatpush1.bf16.msra.mxu0 %v4225_v5  ;;  %3438 = vmatpush1.bf16.msra.mxu1 %v4227_v6  ;;  %v4292_v5 = vcombine.high %v339_v0, %v343_v1  ;;  %v346_v6 = vld [vmem:[#allocation6 + $0x7c0] sm:$0xff]  ;;  %v399_v0 = vld [vmem:[#allocation6 + $0x968] sm:$0xff] }
  0x94   :  { %3267 = vmatprep.subr.bf16.mxu0 %v4234_v7  ;;  %3439 = vmatprep.subr.bf16.mxu1 %v4236_v8  ;;  %v350_v7 = vld [vmem:[#allocation6 + $0x7e0] sm:$0xff]  ;;  %v347_v8 = vld [vmem:[#allocation6 + $0x7c8] sm:$0xff] }
  0x95   :  { %v4298_v12 = vcombine.high %v346_v6, %v350_v7  ;;  %v4297_v21 = vcombine.low %v346_v6, %v350_v7  ;;  %v4299_v22 = vcombine.low %v347_v8, %v351_v9  ;;  %v406_v6 = vld [vmem:[#allocation6 + $0x9a0] sm:$0xff]  ;;  %v403_v7 = vld [vmem:[#allocation6 + $0x988] sm:$0xff] }
  0x97   :  { %3268 = vmatpush1.bf16.msra.mxu0 %v4233_v13  ;;  %3440 = vmatpush1.bf16.msra.mxu1 %v4235_v14  ;;  %v4300_v13 = vcombine.high %v347_v8, %v351_v9  ;;  %v354_v14 = vld [vmem:[#allocation6 + $0x800] sm:$0xff]  ;;  %v407_v8 = vld [vmem:[#allocation6 + $0x9a8] sm:$0xff] }
  0x98   :  { %3269 = vmatprep.subr.bf16.mxu0 %v4242_v16  ;;  %3441 = vmatprep.subr.bf16.mxu1 %v4244_v19  ;;  %v358_v16 = vld [vmem:[#allocation6 + $0x820] sm:$0xff]  ;;  %v355_v19 = vld [vmem:[#allocation6 + $0x808] sm:$0xff] }
  0x99   :  { %v4306_v23 = vcombine.high %v354_v14, %v358_v16 }
  0x9b   :  { %3270 = vmatpush1.bf16.msra.mxu0 %v4241_v24  ;;  %3442 = vmatpush1.bf16.msra.mxu1 %v4243_v53  ;;  %v4308_v24 = vcombine.high %v355_v19, %v359_v20  ;;  %v362_v53 = vld [vmem:[#allocation6 + $0x840] sm:$0xff] }
  0x9c   :  { %3271 = vmatprep.subr.bf16.mxu0 %v4250_v54  ;;  %3443 = vmatprep.subr.bf16.mxu1 %v4252_v26  ;;  %v366_v54 = vld [vmem:[#allocation6 + $0x860] sm:$0xff]  ;;  %v363_v26 = vld [vmem:[#allocation6 + $0x848] sm:$0xff] }
  0x9d   :  { %v4313_v38 = vcombine.low %v362_v53, %v366_v54 }
  0x9f   :  { %3272 = vmatpush1.bf16.msra.mxu0 %v4249_v31  ;;  %3444 = vmatpush1.bf16.msra.mxu1 %v4251_v32  ;;  %v4305_v31 = vcombine.low %v354_v14, %v358_v16  ;;  %v4307_v32 = vcombine.low %v355_v19, %v359_v20  ;;  %v414_v14 = vld [vmem:[#allocation6 + $0x9e0] sm:$0xff]  ;;  %v411_v16 = vld [vmem:[#allocation6 + $0x9c8] sm:$0xff] }
  0xa0   :  { %3273 = vmatprep.subr.bf16.mxu0 %v4258_v33  ;;  %3445 = vmatprep.subr.bf16.mxu1 %v4260_v34  ;;  %v4314_v33 = vcombine.high %v362_v53, %v366_v54  ;;  %v4316_v34 = vcombine.high %v363_v26, %v367_v28  ;;  %v415_v19 = vld [vmem:[#allocation6 + $0x9e8] sm:$0xff]  ;;  %v422_v53 = vld [vmem:[#allocation6 + $0xa20] sm:$0xff] }
  0xa1   :  { %v419_v54 = vld [vmem:[#allocation6 + $0xa08] sm:$0xff] }
  0xa3   :  { %3274 = vmatpush1.bf16.msra.mxu0 %v4257_v39  ;;  %3446 = vmatpush1.bf16.msra.mxu1 %v4259_v40  ;;  %v4315_v39 = vcombine.low %v363_v26, %v367_v28  ;;  %v4322_v40 = vcombine.high %v370_v35, %v374_v36  ;;  %v423_v26 = vld [vmem:[#allocation6 + $0xa28] sm:$0xff]  ;;  %v430_v35 = vld [vmem:[#allocation6 + $0xa60] sm:$0xff] }
  0xa4   :  { %3275 = vmatprep.subr.bf16.mxu0 %v4266_v41  ;;  %3447 = vmatprep.subr.bf16.mxu1 %v4268_v42  ;;  %v4324_v41 = vcombine.high %v371_v17, %v375_v18  ;;  %v378_v42 = vld [vmem:[#allocation6 + $0x8c0] sm:$0xff]  ;;  %v427_v36 = vld [vmem:[#allocation6 + $0xa48] sm:$0xff] }
  0xa5   :  { %v4329_v56 = vcombine.low %v378_v42, %v382_v43 }
  0xa7   :  { %3276 = vmatpush1.bf16.msra.mxu0 %v4265_v47  ;;  %3448 = vmatpush1.bf16.msra.mxu1 %v4267_v48  ;;  %v4323_v47 = vcombine.low %v371_v17, %v375_v18  ;;  %v4330_v48 = vcombine.high %v378_v42, %v382_v43  ;;  %v431_v17 = vld [vmem:[#allocation6 + $0xa68] sm:$0xff]  ;;  %v438_v42 = vld [vmem:[#allocation6 + $0xaa0] sm:$0xff] }
  0xa8   :  { %3277 = vmatprep.subr.bf16.mxu0 %v4274_v49  ;;  %3449 = vmatprep.subr.bf16.mxu1 %v4276_v50  ;;  %v4332_v49 = vcombine.high %v379_v44, %v383_v45  ;;  %v386_v50 = vld [vmem:[#allocation6 + $0x900] sm:$0xff]  ;;  %v435_v43 = vld [vmem:[#allocation6 + $0xa88] sm:$0xff] }
  0xa9   :  { %v4337_v1 = vcombine.low %v386_v50, %v390_v51 }
  0xab   :  { %3278 = vmatpush1.bf16.msra.mxu0 %v4273_v57  ;;  %3450 = vmatpush1.bf16.msra.mxu1 %v4275_v59  ;;  %v4331_v57 = vcombine.low %v379_v44, %v383_v45  ;;  %v4338_v59 = vcombine.high %v386_v50, %v390_v51  ;;  %v439_v44 = vld [vmem:[#allocation6 + $0xaa8] sm:$0xff]  ;;  %v446_v50 = vld [vmem:[#allocation6 + $0xae0] sm:$0xff] }
  0xac   :  { %3279 = vmatprep.subr.bf16.mxu0 %v4282_v60  ;;  %3451 = vmatprep.subr.bf16.mxu1 %v4284_v61  ;;  %v4340_v60 = vcombine.high %v387_v52, %v391_v55  ;;  %v394_v61 = vld [vmem:[#allocation6 + $0x940] sm:$0xff]  ;;  %v443_v51 = vld [vmem:[#allocation6 + $0xac8] sm:$0xff] }
  0xad   :  { %v4345_v9 = vcombine.low %v394_v61, %v398_v62 }
  0xaf   :  { %3280 = vmatpush1.bf16.msra.mxu0 %v4281_v2  ;;  %3452 = vmatpush1.bf16.msra.mxu1 %v4283_v3  ;;  %v4339_v2 = vcombine.low %v387_v52, %v391_v55  ;;  %v4346_v3 = vcombine.high %v394_v61, %v398_v62  ;;  %v447_v52 = vld [vmem:[#allocation6 + $0xae8] sm:$0xff]  ;;  %v454_v61 = vld [vmem:[#allocation6 + $0xb20] sm:$0xff] }
  0xb0   :  { %3281 = vmatprep.subr.bf16.mxu0 %v4290_v4  ;;  %3453 = vmatprep.subr.bf16.mxu1 %v4292_v5  ;;  %v4348_v4 = vcombine.high %v395_v63, %v399_v0  ;;  %v402_v5 = vld [vmem:[#allocation6 + $0x980] sm:$0xff]  ;;  %v451_v62 = vld [vmem:[#allocation6 + $0xb08] sm:$0xff] }
  0xb1   :  { %v4353_v20 = vcombine.low %v402_v5, %v406_v6 }
  0xb3   :  { %3282 = vmatpush1.bf16.msra.mxu0 %v4289_v10  ;;  %3454 = vmatpush1.bf16.msra.mxu1 %v4291_v11  ;;  %v4347_v10 = vcombine.low %v395_v63, %v399_v0  ;;  %v4354_v11 = vcombine.high %v402_v5, %v406_v6  ;;  %v455_v63 = vld [vmem:[#allocation6 + $0xb28] sm:$0xff]  ;;  %v462_v5 = vld [vmem:[#allocation6 + $0xb60] sm:$0xff] }
  0xb4   :  { %3283 = vmatprep.subr.bf16.mxu0 %v4298_v12  ;;  %3455 = vmatprep.subr.bf16.mxu1 %v4300_v13  ;;  %v4356_v12 = vcombine.high %v403_v7, %v407_v8  ;;  %v410_v13 = vld [vmem:[#allocation6 + $0x9c0] sm:$0xff]  ;;  %v459_v6 = vld [vmem:[#allocation6 + $0xb48] sm:$0xff] }
  0xb5   :  { %v4361_v28 = vcombine.low %v410_v13, %v414_v14 }
  0xb7   :  { %3284 = vmatpush1.bf16.msra.mxu0 %v4297_v21  ;;  %3456 = vmatpush1.bf16.msra.mxu1 %v4299_v22  ;;  %v4355_v21 = vcombine.low %v403_v7, %v407_v8  ;;  %v4362_v22 = vcombine.high %v410_v13, %v414_v14  ;;  %v463_v7 = vld [vmem:[#allocation6 + $0xb68] sm:$0xff]  ;;  %v470_v13 = vld [vmem:[#allocation6 + $0xba0] sm:$0xff] }
  0xb8   :  { %3296 = vmatprep.subr.bf16.mxu0 %v4306_v23  ;;  %3468 = vmatprep.subr.bf16.mxu1 %v4308_v24  ;;  %v4364_v23 = vcombine.high %v411_v16, %v415_v19  ;;  %v418_v24 = vld [vmem:[#allocation6 + $0xa00] sm:$0xff]  ;;  %v467_v14 = vld [vmem:[#allocation6 + $0xb88] sm:$0xff] }
  0xb9   :  { %v4369_v18 = vcombine.low %v418_v24, %v422_v53 }
  0xba   :  { %3286 = vmatmul.mubr.bf16.vlgmr.msra.gmra.mrb[0].mxu0 %v4810_v27  ;;  %3458 = vmatmul.mubr.bf16.vlgmr.msra.gmra.mrb[0].mxu1 %v4810_v27 }
  0xbb   :  { %3297 = vmatpush1.bf16.msra.mxu0 %v4305_v31  ;;  %3469 = vmatpush1.bf16.msra.mxu1 %v4307_v32  ;;  %v4363_v31 = vcombine.low %v411_v16, %v415_v19  ;;  %v4370_v32 = vcombine.high %v418_v24, %v422_v53  ;;  %v471_v16 = vld [vmem:[#allocation6 + $0xba8] sm:$0xff]  ;;  %v478_v24 = vld [vmem:[#allocation6 + $0xbe0] sm:$0xff] }
  0xbc   :  { %3298 = vmatprep.subr.bf16.mxu0 %v4314_v33  ;;  %3470 = vmatprep.subr.bf16.mxu1 %v4316_v34  ;;  %v4372_v33 = vcombine.high %v419_v54, %v423_v26  ;;  %v426_v34 = vld [vmem:[#allocation6 + $0xa40] sm:$0xff]  ;;  %v475_v53 = vld [vmem:[#allocation6 + $0xbc8] sm:$0xff] }
  0xbd   :  { %3328 = vmatprep.mubr.bf16.mxu0 %v4818_v37  ;;  %3500 = vmatprep.mubr.bf16.mxu1 %v4818_v37  ;;  %v4377_v45 = vcombine.low %v426_v34, %v430_v35 }
  0xbf   :  { %3299 = vmatpush1.bf16.msra.mxu0 %v4313_v38  ;;  %3471 = vmatpush1.bf16.msra.mxu1 %v4315_v39  ;;  %v4371_v38 = vcombine.low %v419_v54, %v423_v26  ;;  %v4378_v39 = vcombine.high %v426_v34, %v430_v35  ;;  %v479_v54 = vld [vmem:[#allocation6 + $0xbe8] sm:$0xff]  ;;  %v486_v34 = vld [vmem:[#allocation6 + $0xc20] sm:$0xff] }
  0xc0   :  { %3300 = vmatprep.subr.bf16.mxu0 %v4322_v40  ;;  %3472 = vmatprep.subr.bf16.mxu1 %v4324_v41  ;;  %v4380_v40 = vcombine.high %v427_v36, %v431_v17  ;;  %v434_v41 = vld [vmem:[#allocation6 + $0xa80] sm:$0xff]  ;;  %v483_v35 = vld [vmem:[#allocation6 + $0xc08] sm:$0xff] }
  0xc1   :  { %v4385_v55 = vcombine.low %v434_v41, %v438_v42 }
  0xc3   :  { %3301 = vmatpush1.bf16.msra.mxu0 %v4321_v46  ;;  %3473 = vmatpush1.bf16.msra.mxu1 %v4323_v47  ;;  %v4379_v46 = vcombine.low %v427_v36, %v431_v17  ;;  %v4386_v47 = vcombine.high %v434_v41, %v438_v42  ;;  %v487_v36 = vld [vmem:[#allocation6 + $0xc28] sm:$0xff]  ;;  %v494_v41 = vld [vmem:[#allocation6 + $0xc60] sm:$0xff] }
  0xc4   :  { %3302 = vmatprep.subr.bf16.mxu0 %v4330_v48  ;;  %3474 = vmatprep.subr.bf16.mxu1 %v4332_v49  ;;  %v4388_v48 = vcombine.high %v435_v43, %v439_v44  ;;  %v442_v49 = vld [vmem:[#allocation6 + $0xac0] sm:$0xff]  ;;  %v491_v42 = vld [vmem:[#allocation6 + $0xc48] sm:$0xff] }
  0xc5   :  { %v4393_v0 = vcombine.low %v442_v49, %v446_v50 }
  0xc7   :  { %3303 = vmatpush1.bf16.msra.mxu0 %v4329_v56  ;;  %3475 = vmatpush1.bf16.msra.mxu1 %v4331_v57  ;;  %v4387_v56 = vcombine.low %v435_v43, %v439_v44  ;;  %v4394_v57 = vcombine.high %v442_v49, %v446_v50  ;;  %v4826_v43 = vcombine.low %v4812_v29, %v4814_v30  ;;  %v495_v44 = vld [vmem:[#allocation6 + $0xc68] sm:$0xff] }
  0xc8   :  { %3304 = vmatprep.subr.bf16.mxu0 %v4338_v59  ;;  %3476 = vmatprep.subr.bf16.mxu1 %v4340_v60  ;;  %v4396_v59 = vcombine.high %v443_v51, %v447_v52  ;;  %v450_v60 = vld [vmem:[#allocation6 + $0xb00] sm:$0xff]  ;;  %v4444_v50 = vcombine.high %v491_v42, %v495_v44  ;;  %v499_v29 = vld [vmem:[#allocation6 + $0xc88] sm:$0xff] }
  0xc9   :  { %v4401_v8 = vcombine.low %v450_v60, %v454_v61  ;;  %v503_v30 = vld [vmem:[#allocation6 + $0xca8] sm:$0xff] }
  0xcb   :  { %3305 = vmatpush1.bf16.msra.mxu0 %v4337_v1  ;;  %3477 = vmatpush1.bf16.msra.mxu1 %v4339_v2  ;;  %v4395_v1 = vcombine.low %v443_v51, %v447_v52  ;;  %v4402_v2 = vcombine.high %v450_v60, %v454_v61  ;;  %v498_v51 = vld [vmem:[#allocation6 + $0xc80] sm:$0xff]  ;;  %v4452_v60 = vcombine.high %v499_v29, %v503_v30 }
  0xcc   :  { %3306 = vmatprep.subr.bf16.mxu0 %v4346_v3  ;;  %3478 = vmatprep.subr.bf16.mxu1 %v4348_v4  ;;  %v4404_v3 = vcombine.high %v451_v62, %v455_v63  ;;  %v458_v4 = vld [vmem:[#allocation6 + $0xb40] sm:$0xff] }
  0xcd   :  { %v4409_v19 = vcombine.low %v458_v4, %v462_v5  ;;  %v502_v52 = vld [vmem:[#allocation6 + $0xca0] sm:$0xff] }
  0xce   :  { %v506_v61 = vld [vmem:[#allocation6 + $0xcc0] sm:$0xff] }
  0xcf   :  { %3307 = vmatpush1.bf16.msra.mxu0 %v4345_v9  ;;  %3479 = vmatpush1.bf16.msra.mxu1 %v4347_v10  ;;  %v4403_v9 = vcombine.low %v451_v62, %v455_v63  ;;  %v4410_v10 = vcombine.high %v458_v4, %v462_v5  ;;  %v510_v62 = vld [vmem:[#allocation6 + $0xce0] sm:$0xff]  ;;  %v507_v63 = vld [vmem:[#allocation6 + $0xcc8] sm:$0xff] }
  0xd0   :  { %3308 = vmatprep.subr.bf16.mxu0 %v4354_v11  ;;  %3480 = vmatprep.subr.bf16.mxu1 %v4356_v12  ;;  %v4412_v11 = vcombine.high %v459_v6, %v463_v7  ;;  %v466_v12 = vld [vmem:[#allocation6 + $0xb80] sm:$0xff] }
  0xd1   :  { %v4417_v26 = vcombine.low %v466_v12, %v470_v13  ;;  %v514_v5 = vld [vmem:[#allocation6 + $0xd00] sm:$0xff] }
  0xd3   :  { %3309 = vmatpush1.bf16.msra.mxu0 %v4353_v20  ;;  %3481 = vmatpush1.bf16.msra.mxu1 %v4355_v21  ;;  %v4411_v20 = vcombine.low %v459_v6, %v463_v7  ;;  %v4418_v21 = vcombine.high %v466_v12, %v470_v13  ;;  %v518_v6 = vld [vmem:[#allocation6 + $0xd20] sm:$0xff]  ;;  %v515_v7 = vld [vmem:[#allocation6 + $0xd08] sm:$0xff] }
  0xd4   :  { %3310 = vmatprep.subr.bf16.mxu0 %v4362_v22  ;;  %3482 = vmatprep.subr.bf16.mxu1 %v4364_v23  ;;  %v4420_v22 = vcombine.high %v467_v14, %v471_v16  ;;  %v474_v23 = vld [vmem:[#allocation6 + $0xbc0] sm:$0xff] }
  0xd5   :  { %v4425_v17 = vcombine.low %v474_v23, %v478_v24  ;;  %v522_v13 = vld [vmem:[#allocation6 + $0xd40] sm:$0xff] }
  0xd7   :  { %3311 = vmatpush1.bf16.msra.mxu0 %v4361_v28  ;;  %3483 = vmatpush1.bf16.msra.mxu1 %v4363_v31  ;;  %v4419_v28 = vcombine.low %v467_v14, %v471_v16  ;;  %v4426_v31 = vcombine.high %v474_v23, %v478_v24  ;;  %v526_v14 = vld [vmem:[#allocation6 + $0xd60] sm:$0xff]  ;;  %v523_v16 = vld [vmem:[#allocation6 + $0xd48] sm:$0xff] }
  0xd8   :  { %3312 = vmatprep.subr.bf16.mxu0 %v4370_v32  ;;  %3484 = vmatprep.subr.bf16.mxu1 %v4372_v33  ;;  %v4428_v32 = vcombine.high %v475_v53, %v479_v54  ;;  %v482_v33 = vld [vmem:[#allocation6 + $0xc00] sm:$0xff] }
  0xd9   :  { %v530_v24 = vld [vmem:[#allocation6 + $0xd80] sm:$0xff] }
  0xdb   :  { %3313 = vmatpush1.bf16.msra.mxu0 %v4369_v18  ;;  %3485 = vmatpush1.bf16.msra.mxu1 %v4371_v38  ;;  %v4427_v18 = vcombine.low %v475_v53, %v479_v54  ;;  %v4434_v38 = vcombine.high %v482_v33, %v486_v34  ;;  %v534_v53 = vld [vmem:[#allocation6 + $0xda0] sm:$0xff]  ;;  %v531_v54 = vld [vmem:[#allocation6 + $0xd88] sm:$0xff] }
  0xdc   :  { %3314 = vmatprep.subr.bf16.mxu0 %v4378_v39  ;;  %3486 = vmatprep.subr.bf16.mxu1 %v4380_v40  ;;  %v4436_v39 = vcombine.high %v483_v35, %v487_v36  ;;  %v490_v40 = vld [vmem:[#allocation6 + $0xc40] sm:$0xff] }
  0xdd   :  { %v4442_v49 = vcombine.high %v490_v40, %v494_v41 }
  0xdf   :  { %3315 = vmatpush1.bf16.msra.mxu0 %v4377_v45  ;;  %3487 = vmatpush1.bf16.msra.mxu1 %v4379_v46  ;;  %v4828_v45 = vld [vmem:[#allocation3 + $0x18] sm:$0xff] }
  0xe0   :  { %3316 = vmatprep.subr.bf16.mxu0 %v4386_v47  ;;  %3488 = vmatprep.subr.bf16.mxu1 %v4388_v48  ;;  %v4830_v46 = vld [vmem:[#allocation3 + $0x38] sm:$0xff]  ;;  %v4433_v47 = vcombine.low %v482_v33, %v486_v34  ;;  %v4435_v48 = vcombine.low %v483_v35, %v487_v36  ;;  %v538_v34 = vld [vmem:[#allocation6 + $0xdc0] sm:$0xff]  ;;  %v539_v36 = vld [vmem:[#allocation6 + $0xdc8] sm:$0xff] }
  0xe1   :  { %v542_v35 = vld [vmem:[#allocation6 + $0xde0] sm:$0xff] }
  0xe3   :  { %3317 = vmatpush1.bf16.msra.mxu0 %v4385_v55  ;;  %3489 = vmatpush1.bf16.msra.mxu1 %v4387_v56  ;;  %v4834_v55 = vcombine.high %v4828_v45, %v4830_v46  ;;  %v4441_v56 = vcombine.low %v490_v40, %v494_v41  ;;  %v546_v41 = vld [vmem:[#allocation6 + $0xe00] sm:$0xff] }
  0xe4   :  { %3318 = vmatprep.subr.bf16.mxu0 %v4394_v57  ;;  %3490 = vmatprep.subr.bf16.mxu1 %v4396_v59  ;;  %v4443_v57 = vcombine.low %v491_v42, %v495_v44  ;;  %v4450_v59 = vcombine.high %v498_v51, %v502_v52  ;;  %v550_v42 = vld [vmem:[#allocation6 + $0xe20] sm:$0xff]  ;;  %v547_v44 = vld [vmem:[#allocation6 + $0xe08] sm:$0xff] }
  0xe7   :  { %3319 = vmatpush1.bf16.msra.mxu0 %v4393_v0  ;;  %3491 = vmatpush1.bf16.msra.mxu1 %v4395_v1  ;;  %v511_v0 = vld [vmem:[#allocation6 + $0xce8] sm:$0xff]  ;;  %v4449_v1 = vcombine.low %v498_v51, %v502_v52  ;;  %v554_v52 = vld [vmem:[#allocation6 + $0xe40] sm:$0xff] }
  0xe8   :  { %3320 = vmatprep.subr.bf16.mxu0 %v4402_v2  ;;  %3492 = vmatprep.subr.bf16.mxu1 %v4404_v3  ;;  %v4451_v2 = vcombine.low %v499_v29, %v503_v30  ;;  %v4458_v3 = vcombine.high %v506_v61, %v510_v62  ;;  %v4460_v4 = vcombine.high %v507_v63, %v511_v0  ;;  %v558_v29 = vld [vmem:[#allocation6 + $0xe60] sm:$0xff]  ;;  %v555_v30 = vld [vmem:[#allocation6 + $0xe48] sm:$0xff] }
  0xeb   :  { %3321 = vmatpush1.bf16.msra.mxu0 %v4401_v8  ;;  %3493 = vmatpush1.bf16.msra.mxu1 %v4403_v9  ;;  %v519_v8 = vld [vmem:[#allocation6 + $0xd28] sm:$0xff]  ;;  %v4457_v9 = vcombine.low %v506_v61, %v510_v62  ;;  %v562_v62 = vld [vmem:[#allocation6 + $0xe80] sm:$0xff] }
  0xec   :  { %3322 = vmatprep.subr.bf16.mxu0 %v4410_v10  ;;  %3494 = vmatprep.subr.bf16.mxu1 %v4412_v11  ;;  %v4459_v10 = vcombine.low %v507_v63, %v511_v0  ;;  %v4466_v11 = vcombine.high %v514_v5, %v518_v6  ;;  %v4468_v12 = vcombine.high %v515_v7, %v519_v8  ;;  %v566_v63 = vld [vmem:[#allocation6 + $0xea0] sm:$0xff]  ;;  %v563_v0 = vld [vmem:[#allocation6 + $0xe88] sm:$0xff] }
  0xef   :  { %3323 = vmatpush1.bf16.msra.mxu0 %v4409_v19  ;;  %3495 = vmatpush1.bf16.msra.mxu1 %v4411_v20  ;;  %v527_v19 = vld [vmem:[#allocation6 + $0xd68] sm:$0xff]  ;;  %v4465_v20 = vcombine.low %v514_v5, %v518_v6  ;;  %v570_v6 = vld [vmem:[#allocation6 + $0xec0] sm:$0xff] }
  0xf0   :  { %3324 = vmatprep.subr.bf16.mxu0 %v4418_v21  ;;  %3496 = vmatprep.subr.bf16.mxu1 %v4420_v22  ;;  %v4467_v21 = vcombine.low %v515_v7, %v519_v8  ;;  %v4474_v22 = vcombine.high %v522_v13, %v526_v14  ;;  %v4476_v23 = vcombine.high %v523_v16, %v527_v19  ;;  %v574_v7 = vld [vmem:[#allocation6 + $0xee0] sm:$0xff]  ;;  %v571_v8 = vld [vmem:[#allocation6 + $0xec8] sm:$0xff] }
  0xf3   :  { %3325 = vmatpush1.bf16.msra.mxu0 %v4417_v26  ;;  %3497 = vmatpush1.bf16.msra.mxu1 %v4419_v28  ;;  %v535_v26 = vld [vmem:[#allocation6 + $0xda8] sm:$0xff]  ;;  %v4473_v28 = vcombine.low %v522_v13, %v526_v14  ;;  %v578_v14 = vld [vmem:[#allocation6 + $0xf00] sm:$0xff] }
  0xf4   :  { %3326 = vmatprep.subr.bf16.mxu0 %v4426_v31  ;;  %3498 = vmatprep.subr.bf16.mxu1 %v4428_v32  ;;  %v4475_v31 = vcombine.low %v523_v16, %v527_v19  ;;  %v4482_v32 = vcombine.high %v530_v24, %v534_v53  ;;  %v4484_v33 = vcombine.high %v531_v54, %v535_v26  ;;  %v582_v16 = vld [vmem:[#allocation6 + $0xf20] sm:$0xff]  ;;  %v579_v19 = vld [vmem:[#allocation6 + $0xf08] sm:$0xff] }
  0xf7   :  { %3327 = vmatpush1.bf16.msra.mxu0 %v4425_v17  ;;  %3499 = vmatpush1.bf16.msra.mxu1 %v4427_v18  ;;  %v543_v17 = vld [vmem:[#allocation6 + $0xde8] sm:$0xff]  ;;  %v4481_v18 = vcombine.low %v530_v24, %v534_v53  ;;  %v586_v53 = vld [vmem:[#allocation6 + $0xf40] sm:$0xff] }
  0xf8   :  { %3339 = vmatprep.subr.bf16.mxu0 %v4434_v38  ;;  %3511 = vmatprep.subr.bf16.mxu1 %v4436_v39  ;;  %v4483_v38 = vcombine.low %v531_v54, %v535_v26  ;;  %v4490_v39 = vcombine.high %v538_v34, %v542_v35  ;;  %v4492_v40 = vcombine.high %v539_v36, %v543_v17  ;;  %v590_v54 = vld [vmem:[#allocation6 + $0xf60] sm:$0xff]  ;;  %v587_v26 = vld [vmem:[#allocation6 + $0xf48] sm:$0xff] }
  0xfa   :  { %3329 = vmatmul.mubr.bf16.vlgmr.msra.gmra.mrb[0].mxu0 %v4826_v43  ;;  %3501 = vmatmul.mubr.bf16.vlgmr.msra.gmra.mrb[0].mxu1 %v4826_v43 }
  0xfb   :  { %3340 = vmatpush1.bf16.msra.mxu0 %v4433_v47  ;;  %3512 = vmatpush1.bf16.msra.mxu1 %v4435_v48  ;;  %v551_v47 = vld [vmem:[#allocation6 + $0xe28] sm:$0xff]  ;;  %v4489_v48 = vcombine.low %v538_v34, %v542_v35  ;;  %v594_v35 = vld [vmem:[#allocation6 + $0xf80] sm:$0xff] }
  0xfc   :  { %3341 = vmatprep.subr.bf16.mxu0 %v4442_v49  ;;  %3513 = vmatprep.subr.bf16.mxu1 %v4444_v50  ;;  %v4491_v49 = vcombine.low %v539_v36, %v543_v17  ;;  %v4498_v50 = vcombine.high %v546_v41, %v550_v42  ;;  %v4500_v51 = vcombine.high %v547_v44, %v551_v47  ;;  %v598_v36 = vld [vmem:[#allocation6 + $0xfa0] sm:$0xff]  ;;  %v595_v17 = vld [vmem:[#allocation6 + $0xf88] sm:$0xff] }
  0xfd   :  { %3371 = vmatprep.mubr.bf16.mxu0 %v4834_v55  ;;  %3543 = vmatprep.mubr.bf16.mxu1 %v4834_v55 }
  0xff   :  { %3342 = vmatpush1.bf16.msra.mxu0 %v4441_v56  ;;  %3514 = vmatpush1.bf16.msra.mxu1 %v4443_v57  ;;  %v559_v56 = vld [vmem:[#allocation6 + $0xe68] sm:$0xff]  ;;  %v4497_v57 = vcombine.low %v546_v41, %v550_v42  ;;  %v602_v42 = vld [vmem:[#allocation6 + $0xfc0] sm:$0xff] }
 0x100   :  { %3343 = vmatprep.subr.bf16.mxu0 %v4450_v59  ;;  %3515 = vmatprep.subr.bf16.mxu1 %v4452_v60  ;;  %v4499_v59 = vcombine.low %v547_v44, %v551_v47  ;;  %v4506_v60 = vcombine.high %v554_v52, %v558_v29  ;;  %v4508_v61 = vcombine.high %v555_v30, %v559_v56  ;;  %v606_v44 = vld [vmem:[#allocation6 + $0xfe0] sm:$0xff]  ;;  %v603_v47 = vld [vmem:[#allocation6 + $0xfc8] sm:$0xff] }
 0x103   :  { %3344 = vmatpush1.bf16.msra.mxu0 %v4449_v1  ;;  %3516 = vmatpush1.bf16.msra.mxu1 %v4451_v2  ;;  %v567_v1 = vld [vmem:[#allocation6 + $0xea8] sm:$0xff]  ;;  %v4505_v2 = vcombine.low %v554_v52, %v558_v29  ;;  %v100_v29 = vld [vmem:[#allocation6 + $0x10] sm:$0xff] }
 0x104   :  { %3345 = vmatprep.subr.bf16.mxu0 %v4458_v3  ;;  %3517 = vmatprep.subr.bf16.mxu1 %v4460_v4  ;;  %v4507_v3 = vcombine.low %v555_v30, %v559_v56  ;;  %v4514_v4 = vcombine.high %v562_v62, %v566_v63  ;;  %v4516_v5 = vcombine.high %v563_v0, %v567_v1  ;;  %v104_v30 = vld [vmem:[#allocation6 + $0x30] sm:$0xff]  ;;  %v101_v56 = vld [vmem:[#allocation6 + $0x18] sm:$0xff] }
 0x107   :  { %3346 = vmatpush1.bf16.msra.mxu0 %v4457_v9  ;;  %3518 = vmatpush1.bf16.msra.mxu1 %v4459_v10  ;;  %v575_v9 = vld [vmem:[#allocation6 + $0xee8] sm:$0xff]  ;;  %v4513_v10 = vcombine.low %v562_v62, %v566_v63  ;;  %v108_v63 = vld [vmem:[#allocation6 + $0x50] sm:$0xff] }
 0x108   :  { %3347 = vmatprep.subr.bf16.mxu0 %v4466_v11  ;;  %3519 = vmatprep.subr.bf16.mxu1 %v4468_v12  ;;  %v4515_v11 = vcombine.low %v563_v0, %v567_v1  ;;  %v4522_v12 = vcombine.high %v570_v6, %v574_v7  ;;  %v4524_v13 = vcombine.high %v571_v8, %v575_v9  ;;  %v112_v0 = vld [vmem:[#allocation6 + $0x70] sm:$0xff] }
 0x109   :  { %v4842_v1 = vcombine.low %v4828_v45, %v4830_v46  ;;  %v4061_v45 = vcombine.low %v108_v63, %v112_v0 }
 0x10b   :  { %3348 = vmatpush1.bf16.msra.mxu0 %v4465_v20  ;;  %3520 = vmatpush1.bf16.msra.mxu1 %v4467_v21  ;;  %v583_v20 = vld [vmem:[#allocation6 + $0xf28] sm:$0xff]  ;;  %v4521_v21 = vcombine.low %v570_v6, %v574_v7  ;;  %v4062_v6 = vcombine.high %v108_v63, %v112_v0  ;;  %v168_v63 = vld [vmem:[#allocation6 + $0x230] sm:$0xff]  ;;  %v165_v0 = vld [vmem:[#allocation6 + $0x218] sm:$0xff] }
 0x10c   :  { %3349 = vmatprep.subr.bf16.mxu0 %v4474_v22  ;;  %3521 = vmatprep.subr.bf16.mxu1 %v4476_v23  ;;  %v4523_v22 = vcombine.low %v571_v8, %v575_v9  ;;  %v4530_v23 = vcombine.high %v578_v14, %v582_v16  ;;  %v4532_v24 = vcombine.high %v579_v19, %v583_v20  ;;  %v116_v8 = vld [vmem:[#allocation6 + $0x90] sm:$0xff] }
 0x10d   :  { %v120_v9 = vld [vmem:[#allocation6 + $0xb0] sm:$0xff] }
 0x10f   :  { %3350 = vmatpush1.bf16.msra.mxu0 %v4473_v28  ;;  %3522 = vmatpush1.bf16.msra.mxu1 %v4475_v31  ;;  %v591_v28 = vld [vmem:[#allocation6 + $0xf68] sm:$0xff]  ;;  %v4529_v31 = vcombine.low %v578_v14, %v582_v16  ;;  %v124_v14 = vld [vmem:[#allocation6 + $0xd0] sm:$0xff] }
 0x110   :  { %3351 = vmatprep.subr.bf16.mxu0 %v4482_v32  ;;  %3523 = vmatprep.subr.bf16.mxu1 %v4484_v33  ;;  %v4531_v32 = vcombine.low %v579_v19, %v583_v20  ;;  %v4538_v33 = vcombine.high %v586_v53, %v590_v54  ;;  %v4540_v34 = vcombine.high %v587_v26, %v591_v28  ;;  %v128_v16 = vld [vmem:[#allocation6 + $0xf0] sm:$0xff]  ;;  %v125_v19 = vld [vmem:[#allocation6 + $0xd8] sm:$0xff] }
 0x111   :  { %v129_v20 = vld [vmem:[#allocation6 + $0xf8] sm:$0xff] }
 0x113   :  { %3352 = vmatpush1.bf16.msra.mxu0 %v4481_v18  ;;  %3524 = vmatpush1.bf16.msra.mxu1 %v4483_v38  ;;  %v599_v18 = vld [vmem:[#allocation6 + $0xfa8] sm:$0xff]  ;;  %v4537_v38 = vcombine.low %v586_v53, %v590_v54  ;;  %v132_v53 = vld [vmem:[#allocation6 + $0x110] sm:$0xff] }
 0x114   :  { %3353 = vmatprep.subr.bf16.mxu0 %v4490_v39  ;;  %3525 = vmatprep.subr.bf16.mxu1 %v4492_v40  ;;  %v4539_v39 = vcombine.low %v587_v26, %v591_v28  ;;  %v4546_v40 = vcombine.high %v594_v35, %v598_v36  ;;  %v4548_v41 = vcombine.high %v595_v17, %v599_v18  ;;  %v136_v54 = vld [vmem:[#allocation6 + $0x130] sm:$0xff]  ;;  %v133_v26 = vld [vmem:[#allocation6 + $0x118] sm:$0xff] }
 0x115   :  { %v137_v28 = vld [vmem:[#allocation6 + $0x138] sm:$0xff] }
 0x117   :  { %3354 = vmatpush1.bf16.msra.mxu0 %v4489_v48  ;;  %3526 = vmatpush1.bf16.msra.mxu1 %v4491_v49  ;;  %v607_v48 = vld [vmem:[#allocation6 + $0xfe8] sm:$0xff]  ;;  %v4545_v49 = vcombine.low %v594_v35, %v598_v36  ;;  %v144_v35 = vld [vmem:[#allocation6 + $0x170] sm:$0xff]  ;;  %v141_v36 = vld [vmem:[#allocation6 + $0x158] sm:$0xff] }
 0x118   :  { %3355 = vmatprep.subr.bf16.mxu0 %v4498_v50  ;;  %3527 = vmatprep.subr.bf16.mxu1 %v4500_v51  ;;  %v4547_v50 = vcombine.low %v595_v17, %v599_v18  ;;  %v4554_v51 = vcombine.high %v602_v42, %v606_v44  ;;  %v4556_v52 = vcombine.high %v603_v47, %v607_v48  ;;  %v145_v17 = vld [vmem:[#allocation6 + $0x178] sm:$0xff] }
 0x119   :  { %v4085_v18 = vcombine.low %v132_v53, %v136_v54 }
 0x11b   :  { %3356 = vmatpush1.bf16.msra.mxu0 %v4497_v57  ;;  %3528 = vmatpush1.bf16.msra.mxu1 %v4499_v59  ;;  %v105_v57 = vld [vmem:[#allocation6 + $0x38] sm:$0xff]  ;;  %v4553_v59 = vcombine.low %v602_v42, %v606_v44  ;;  %v152_v42 = vld [vmem:[#allocation6 + $0x1b0] sm:$0xff] }
 0x11c   :  { %3357 = vmatprep.subr.bf16.mxu0 %v4506_v60  ;;  %3529 = vmatprep.subr.bf16.mxu1 %v4508_v61  ;;  %v4555_v60 = vcombine.low %v603_v47, %v607_v48  ;;  %v4054_v61 = vcombine.high %v100_v29, %v104_v30  ;;  %v4056_v62 = vcombine.high %v101_v56, %v105_v57  ;;  %v149_v44 = vld [vmem:[#allocation6 + $0x198] sm:$0xff] }
 0x11d   :  { %v153_v47 = vld [vmem:[#allocation6 + $0x1b8] sm:$0xff] }
 0x11f   :  { %3358 = vmatpush1.bf16.msra.mxu0 %v4505_v2  ;;  %3530 = vmatpush1.bf16.msra.mxu1 %v4507_v3  ;;  %v109_v2 = vld [vmem:[#allocation6 + $0x58] sm:$0xff] }
 0x120   :  { %3359 = vmatprep.subr.bf16.mxu0 %v4514_v4  ;;  %3531 = vmatprep.subr.bf16.mxu1 %v4516_v5  ;;  %v113_v3 = vld [vmem:[#allocation6 + $0x78] sm:$0xff]  ;;  %v4053_v4 = vcombine.low %v100_v29, %v104_v30  ;;  %v4055_v5 = vcombine.low %v101_v56, %v105_v57  ;;  %v160_v29 = vld [vmem:[#allocation6 + $0x1f0] sm:$0xff] }
 0x121   :  { %v4064_v7 = vcombine.high %v109_v2, %v113_v3  ;;  %v4063_v46 = vcombine.low %v109_v2, %v113_v3  ;;  %v157_v30 = vld [vmem:[#allocation6 + $0x1d8] sm:$0xff] }
 0x122   :  { %v161_v56 = vld [vmem:[#allocation6 + $0x1f8] sm:$0xff] }
 0x123   :  { %3360 = vmatpush1.bf16.msra.mxu0 %v4513_v10  ;;  %3532 = vmatpush1.bf16.msra.mxu1 %v4515_v11  ;;  %v117_v10 = vld [vmem:[#allocation6 + $0x98] sm:$0xff] }
 0x124   :  { %3361 = vmatprep.subr.bf16.mxu0 %v4522_v12  ;;  %3533 = vmatprep.subr.bf16.mxu1 %v4524_v13  ;;  %v121_v11 = vld [vmem:[#allocation6 + $0xb8] sm:$0xff]  ;;  %v4070_v12 = vcombine.high %v116_v8, %v120_v9 }
 0x125   :  { %v4072_v13 = vcombine.high %v117_v10, %v121_v11  ;;  %v169_v2 = vld [vmem:[#allocation6 + $0x238] sm:$0xff] }
 0x127   :  { %3362 = vmatpush1.bf16.msra.mxu0 %v4521_v21  ;;  %3534 = vmatpush1.bf16.msra.mxu1 %v4523_v22  ;;  %v4069_v21 = vcombine.low %v116_v8, %v120_v9  ;;  %v4071_v22 = vcombine.low %v117_v10, %v121_v11  ;;  %v176_v8 = vld [vmem:[#allocation6 + $0x270] sm:$0xff]  ;;  %v173_v9 = vld [vmem:[#allocation6 + $0x258] sm:$0xff] }
 0x128   :  { %3363 = vmatprep.subr.bf16.mxu0 %v4530_v23  ;;  %3535 = vmatprep.subr.bf16.mxu1 %v4532_v24  ;;  %v4078_v23 = vcombine.high %v124_v14, %v128_v16  ;;  %v4080_v24 = vcombine.high %v125_v19, %v129_v20  ;;  %v177_v10 = vld [vmem:[#allocation6 + $0x278] sm:$0xff] }
 0x12b   :  { %3364 = vmatpush1.bf16.msra.mxu0 %v4529_v31  ;;  %3536 = vmatpush1.bf16.msra.mxu1 %v4531_v32  ;;  %v4077_v31 = vcombine.low %v124_v14, %v128_v16  ;;  %v4079_v32 = vcombine.low %v125_v19, %v129_v20  ;;  %v184_v14 = vld [vmem:[#allocation6 + $0x2b0] sm:$0xff]  ;;  %v181_v16 = vld [vmem:[#allocation6 + $0x298] sm:$0xff] }
 0x12c   :  { %3365 = vmatprep.subr.bf16.mxu0 %v4538_v33  ;;  %3537 = vmatprep.subr.bf16.mxu1 %v4540_v34  ;;  %v4086_v33 = vcombine.high %v132_v53, %v136_v54  ;;  %v140_v34 = vld [vmem:[#allocation6 + $0x150] sm:$0xff]  ;;  %v185_v19 = vld [vmem:[#allocation6 + $0x2b8] sm:$0xff] }
 0x12d   :  { %v4093_v48 = vcombine.low %v140_v34, %v144_v35  ;;  %v192_v53 = vld [vmem:[#allocation6 + $0x2f0] sm:$0xff]  ;;  %v189_v54 = vld [vmem:[#allocation6 + $0x2d8] sm:$0xff] }
 0x12f   :  { %3366 = vmatpush1.bf16.msra.mxu0 %v4537_v38  ;;  %3538 = vmatpush1.bf16.msra.mxu1 %v4539_v39  ;;  %v4087_v38 = vcombine.low %v133_v26, %v137_v28  ;;  %v4094_v39 = vcombine.high %v140_v34, %v144_v35  ;;  %v200_v34 = vld [vmem:[#allocation6 + $0x330] sm:$0xff]  ;;  %v197_v35 = vld [vmem:[#allocation6 + $0x318] sm:$0xff] }
 0x130   :  { %3367 = vmatprep.subr.bf16.mxu0 %v4546_v40  ;;  %3539 = vmatprep.subr.bf16.mxu1 %v4548_v41  ;;  %v4096_v40 = vcombine.high %v141_v36, %v145_v17  ;;  %v148_v41 = vld [vmem:[#allocation6 + $0x190] sm:$0xff] }
 0x131   :  { %v4101_v57 = vcombine.low %v148_v41, %v152_v42 }
 0x133   :  { %3368 = vmatpush1.bf16.msra.mxu0 %v4545_v49  ;;  %3540 = vmatpush1.bf16.msra.mxu1 %v4547_v50  ;;  %v4095_v49 = vcombine.low %v141_v36, %v145_v17  ;;  %v4102_v50 = vcombine.high %v148_v41, %v152_v42  ;;  %v201_v36 = vld [vmem:[#allocation6 + $0x338] sm:$0xff]  ;;  %v208_v41 = vld [vmem:[#allocation6 + $0x370] sm:$0xff] }
 0x134   :  { %3369 = vmatprep.subr.bf16.mxu0 %v4554_v51  ;;  %3541 = vmatprep.subr.bf16.mxu1 %v4556_v52  ;;  %v4104_v51 = vcombine.high %v149_v44, %v153_v47  ;;  %v156_v52 = vld [vmem:[#allocation6 + $0x1d0] sm:$0xff]  ;;  %v205_v42 = vld [vmem:[#allocation6 + $0x358] sm:$0xff] }
 0x135   :  { %v4109_v3 = vcombine.low %v156_v52, %v160_v29 }
 0x137   :  { %3370 = vmatpush1.bf16.msra.mxu0 %v4553_v59  ;;  %3542 = vmatpush1.bf16.msra.mxu1 %v4555_v60  ;;  %v4103_v59 = vcombine.low %v149_v44, %v153_v47  ;;  %v4110_v60 = vcombine.high %v156_v52, %v160_v29  ;;  %v209_v44 = vld [vmem:[#allocation6 + $0x378] sm:$0xff]  ;;  %v216_v52 = vld [vmem:[#allocation6 + $0x3b0] sm:$0xff] }
 0x138   :  { %3554 = vmatprep.subr.bf16.mxu0 %v4054_v61  ;;  %3726 = vmatprep.subr.bf16.mxu1 %v4056_v62  ;;  %v4112_v61 = vcombine.high %v157_v30, %v161_v56  ;;  %v164_v62 = vld [vmem:[#allocation6 + $0x210] sm:$0xff]  ;;  %v213_v29 = vld [vmem:[#allocation6 + $0x398] sm:$0xff] }
 0x139   :  { %v4117_v11 = vcombine.low %v164_v62, %v168_v63 }
 0x13a   :  { %3372 = vmatmul.mubr.bf16.vlgmr.msra.gmra.mrb[0].mxu0 %v4842_v1  ;;  %3544 = vmatmul.mubr.bf16.vlgmr.msra.gmra.mrb[0].mxu1 %v4842_v1 }
 0x13b   :  { %3555 = vmatpush1.bf16.msra.mxu0 %v4053_v4  ;;  %3727 = vmatpush1.bf16.msra.mxu1 %v4055_v5  ;;  %v4111_v4 = vcombine.low %v157_v30, %v161_v56  ;;  %v4118_v5 = vcombine.high %v164_v62, %v168_v63  ;;  %v217_v30 = vld [vmem:[#allocation6 + $0x3b8] sm:$0xff]  ;;  %v224_v62 = vld [vmem:[#allocation6 + $0x3f0] sm:$0xff] }
 0x13c   :  { %3556 = vmatprep.subr.bf16.mxu0 %v4062_v6  ;;  %3728 = vmatprep.subr.bf16.mxu1 %v4064_v7  ;;  %v4120_v6 = vcombine.high %v165_v0, %v169_v2  ;;  %v172_v7 = vld [vmem:[#allocation6 + $0x250] sm:$0xff]  ;;  %v221_v63 = vld [vmem:[#allocation6 + $0x3d8] sm:$0xff] }
 0x13d   :  { %3586 = vmatprep.mubr.bf16.mxu0 %v4788_v58  ;;  %3758 = vmatprep.mubr.bf16.mxu1 %v4788_v58  ;;  %v4088_v58 = vcombine.high %v133_v26, %v137_v28  ;;  %v4125_v20 = vcombine.low %v172_v7, %v176_v8  ;;  %v193_v26 = vld [vmem:[#allocation6 + $0x2f8] sm:$0xff] }
 0x13f   :  { %3557 = vmatpush1.bf16.msra.mxu0 %v4061_v45  ;;  %3729 = vmatpush1.bf16.msra.mxu1 %v4063_v46  ;;  %v4119_v45 = vcombine.low %v165_v0, %v169_v2  ;;  %v4126_v46 = vcombine.high %v172_v7, %v176_v8  ;;  %v225_v0 = vld [vmem:[#allocation6 + $0x3f8] sm:$0xff]  ;;  %v232_v7 = vld [vmem:[#allocation6 + $0x430] sm:$0xff] }
 0x140   :  { %3558 = vmatprep.subr.bf16.mxu0 %v4070_v12  ;;  %3730 = vmatprep.subr.bf16.mxu1 %v4072_v13  ;;  %v4128_v12 = vcombine.high %v173_v9, %v177_v10  ;;  %v180_v13 = vld [vmem:[#allocation6 + $0x290] sm:$0xff]  ;;  %v229_v8 = vld [vmem:[#allocation6 + $0x418] sm:$0xff] }
 0x141   :  { %v4133_v28 = vcombine.low %v180_v13, %v184_v14 }
 0x143   :  { %3559 = vmatpush1.bf16.msra.mxu0 %v4069_v21  ;;  %3731 = vmatpush1.bf16.msra.mxu1 %v4071_v22  ;;  %v4127_v21 = vcombine.low %v173_v9, %v177_v10  ;;  %v4134_v22 = vcombine.high %v180_v13, %v184_v14  ;;  %v233_v9 = vld [vmem:[#allocation6 + $0x438] sm:$0xff]  ;;  %v240_v13 = vld [vmem:[#allocation6 + $0x470] sm:$0xff] }
 0x144   :  { %3560 = vmatprep.subr.bf16.mxu0 %v4078_v23  ;;  %3732 = vmatprep.subr.bf16.mxu1 %v4080_v24  ;;  %v4136_v23 = vcombine.high %v181_v16, %v185_v19  ;;  %v188_v24 = vld [vmem:[#allocation6 + $0x2d0] sm:$0xff]  ;;  %v237_v14 = vld [vmem:[#allocation6 + $0x458] sm:$0xff] }
 0x145   :  { %v4141_v17 = vcombine.low %v188_v24, %v192_v53 }
 0x147   :  { %3561 = vmatpush1.bf16.msra.mxu0 %v4077_v31  ;;  %3733 = vmatpush1.bf16.msra.mxu1 %v4079_v32  ;;  %v4135_v31 = vcombine.low %v181_v16, %v185_v19  ;;  %v4142_v32 = vcombine.high %v188_v24, %v192_v53  ;;  %v241_v16 = vld [vmem:[#allocation6 + $0x478] sm:$0xff]  ;;  %v248_v24 = vld [vmem:[#allocation6 + $0x4b0] sm:$0xff] }
 0x148   :  { %3562 = vmatprep.subr.bf16.mxu0 %v4086_v33  ;;  %3734 = vmatprep.subr.bf16.mxu1 %v4088_v58  ;;  %v4144_v33 = vcombine.high %v189_v54, %v193_v26  ;;  %v196_v58 = vld [vmem:[#allocation6 + $0x310] sm:$0xff]  ;;  %v245_v53 = vld [vmem:[#allocation6 + $0x498] sm:$0xff] }
 0x149   :  { %v4149_v47 = vcombine.low %v196_v58, %v200_v34 }
 0x14b   :  { %3563 = vmatpush1.bf16.msra.mxu0 %v4085_v18  ;;  %3735 = vmatpush1.bf16.msra.mxu1 %v4087_v38  ;;  %v4143_v18 = vcombine.low %v189_v54, %v193_v26  ;;  %v4150_v38 = vcombine.high %v196_v58, %v200_v34  ;;  %v249_v54 = vld [vmem:[#allocation6 + $0x4b8] sm:$0xff]  ;;  %v256_v58 = vld [vmem:[#allocation6 + $0x4f0] sm:$0xff] }
 0x14c   :  { %3564 = vmatprep.subr.bf16.mxu0 %v4094_v39  ;;  %3736 = vmatprep.subr.bf16.mxu1 %v4096_v40  ;;  %v4152_v39 = vcombine.high %v197_v35, %v201_v36  ;;  %v204_v40 = vld [vmem:[#allocation6 + $0x350] sm:$0xff]  ;;  %v253_v34 = vld [vmem:[#allocation6 + $0x4d8] sm:$0xff] }
 0x14d   :  { %v4157_v56 = vcombine.low %v204_v40, %v208_v41 }
 0x14f   :  { %3565 = vmatpush1.bf16.msra.mxu0 %v4093_v48  ;;  %3737 = vmatpush1.bf16.msra.mxu1 %v4095_v49  ;;  %v4151_v48 = vcombine.low %v197_v35, %v201_v36  ;;  %v4158_v49 = vcombine.high %v204_v40, %v208_v41  ;;  %v257_v35 = vld [vmem:[#allocation6 + $0x4f8] sm:$0xff] }
 0x150   :  { %3566 = vmatprep.subr.bf16.mxu0 %v4102_v50  ;;  %3738 = vmatprep.subr.bf16.mxu1 %v4104_v51  ;;  %v4160_v50 = vcombine.high %v205_v42, %v209_v44  ;;  %v212_v51 = vld [vmem:[#allocation6 + $0x390] sm:$0xff]  ;;  %v261_v40 = vld [vmem:[#allocation6 + $0x518] sm:$0xff] }
 0x151   :  { %v4165_v2 = vcombine.low %v212_v51, %v216_v52  ;;  %v265_v41 = vld [vmem:[#allocation6 + $0x538] sm:$0xff] }
 0x153   :  { %3567 = vmatpush1.bf16.msra.mxu0 %v4101_v57  ;;  %3739 = vmatpush1.bf16.msra.mxu1 %v4103_v59  ;;  %v4159_v57 = vcombine.low %v205_v42, %v209_v44  ;;  %v4166_v59 = vcombine.high %v212_v51, %v216_v52  ;;  %v4207_v44 = vcombine.low %v253_v34, %v257_v35  ;;  %v273_v51 = vld [vmem:[#allocation6 + $0x578] sm:$0xff] }
 0x154   :  { %3568 = vmatprep.subr.bf16.mxu0 %v4110_v60  ;;  %3740 = vmatprep.subr.bf16.mxu1 %v4112_v61  ;;  %v4168_v60 = vcombine.high %v213_v29, %v217_v30  ;;  %v220_v61 = vld [vmem:[#allocation6 + $0x3d0] sm:$0xff] }
 0x155   :  { %v4173_v10 = vcombine.low %v220_v61, %v224_v62 }
 0x157   :  { %3569 = vmatpush1.bf16.msra.mxu0 %v4109_v3  ;;  %3741 = vmatpush1.bf16.msra.mxu1 %v4111_v4  ;;  %v4167_v3 = vcombine.low %v213_v29, %v217_v30  ;;  %v4174_v4 = vcombine.high %v220_v61, %v224_v62  ;;  %v4215_v29 = vcombine.low %v261_v40, %v265_v41  ;;  %v281_v61 = vld [vmem:[#allocation6 + $0x5b8] sm:$0xff] }
 0x158   :  { %3570 = vmatprep.subr.bf16.mxu0 %v4118_v5  ;;  %3742 = vmatprep.subr.bf16.mxu1 %v4120_v6  ;;  %v4176_v5 = vcombine.high %v221_v63, %v225_v0  ;;  %v228_v6 = vld [vmem:[#allocation6 + $0x410] sm:$0xff] }
 0x159   :  { %v4181_v19 = vcombine.low %v228_v6, %v232_v7 }
 0x15b   :  { %3571 = vmatpush1.bf16.msra.mxu0 %v4117_v11  ;;  %3743 = vmatpush1.bf16.msra.mxu1 %v4119_v45  ;;  %v4175_v11 = vcombine.low %v221_v63, %v225_v0  ;;  %v4182_v45 = vcombine.high %v228_v6, %v232_v7  ;;  %v289_v6 = vld [vmem:[#allocation6 + $0x5f8] sm:$0xff] }
 0x15c   :  { %3572 = vmatprep.subr.bf16.mxu0 %v4126_v46  ;;  %3744 = vmatprep.subr.bf16.mxu1 %v4128_v12  ;;  %v4184_v46 = vcombine.high %v229_v8, %v233_v9  ;;  %v236_v12 = vld [vmem:[#allocation6 + $0x450] sm:$0xff] }
 0x15d   :  { %v4189_v26 = vcombine.low %v236_v12, %v240_v13 }
 0x15f   :  { %3573 = vmatpush1.bf16.msra.mxu0 %v4125_v20  ;;  %3745 = vmatpush1.bf16.msra.mxu1 %v4127_v21  ;;  %v4183_v20 = vcombine.low %v229_v8, %v233_v9  ;;  %v4190_v21 = vcombine.high %v236_v12, %v240_v13  ;;  %v297_v12 = vld [vmem:[#allocation6 + $0x638] sm:$0xff] }
 0x160   :  { %3574 = vmatprep.subr.bf16.mxu0 %v4134_v22  ;;  %3746 = vmatprep.subr.bf16.mxu1 %v4136_v23  ;;  %v4192_v22 = vcombine.high %v237_v14, %v241_v16  ;;  %v244_v23 = vld [vmem:[#allocation6 + $0x490] sm:$0xff] }
 0x161   :  { %v4197_v36 = vcombine.low %v244_v23, %v248_v24 }
 0x163   :  { %3575 = vmatpush1.bf16.msra.mxu0 %v4133_v28  ;;  %3747 = vmatpush1.bf16.msra.mxu1 %v4135_v31  ;;  %v4191_v28 = vcombine.low %v237_v14, %v241_v16  ;;  %v4198_v31 = vcombine.high %v244_v23, %v248_v24  ;;  %v305_v23 = vld [vmem:[#allocation6 + $0x678] sm:$0xff] }
 0x164   :  { %3576 = vmatprep.subr.bf16.mxu0 %v4142_v32  ;;  %3748 = vmatprep.subr.bf16.mxu1 %v4144_v33  ;;  %v4200_v32 = vcombine.high %v245_v53, %v249_v54  ;;  %v252_v33 = vld [vmem:[#allocation6 + $0x4d0] sm:$0xff] }
 0x165   :  { %v4205_v42 = vcombine.low %v252_v33, %v256_v58 }
 0x167   :  { %3577 = vmatpush1.bf16.msra.mxu0 %v4141_v17  ;;  %3749 = vmatpush1.bf16.msra.mxu1 %v4143_v18  ;;  %v4206_v17 = vcombine.high %v252_v33, %v256_v58  ;;  %v4208_v18 = vcombine.high %v253_v34, %v257_v35  ;;  %v313_v33 = vld [vmem:[#allocation6 + $0x6b8] sm:$0xff] }
 0x168   :  { %3578 = vmatprep.subr.bf16.mxu0 %v4150_v38  ;;  %3750 = vmatprep.subr.bf16.mxu1 %v4152_v39  ;;  %v260_v38 = vld [vmem:[#allocation6 + $0x510] sm:$0xff] }
 0x169   :  { %v264_v39 = vld [vmem:[#allocation6 + $0x530] sm:$0xff] }
 0x16a   :  { %v4213_v52 = vcombine.low %v260_v38, %v264_v39 }
 0x16b   :  { %3579 = vmatpush1.bf16.msra.mxu0 %v4149_v47  ;;  %3751 = vmatpush1.bf16.msra.mxu1 %v4151_v48  ;;  %v4214_v47 = vcombine.high %v260_v38, %v264_v39  ;;  %v268_v48 = vld [vmem:[#allocation6 + $0x550] sm:$0xff]  ;;  %v321_v38 = vld [vmem:[#allocation6 + $0x6f8] sm:$0xff] }
 0x16c   :  { %3580 = vmatprep.subr.bf16.mxu0 %v4158_v49  ;;  %3752 = vmatprep.subr.bf16.mxu1 %v4160_v50  ;;  %v272_v49 = vld [vmem:[#allocation6 + $0x570] sm:$0xff]  ;;  %v269_v50 = vld [vmem:[#allocation6 + $0x558] sm:$0xff] }
 0x16d   :  { %v4222_v30 = vcombine.high %v268_v48, %v272_v49  ;;  %v4221_v62 = vcombine.low %v268_v48, %v272_v49  ;;  %v4223_v63 = vcombine.low %v269_v50, %v273_v51  ;;  %v329_v48 = vld [vmem:[#allocation6 + $0x738] sm:$0xff] }
 0x16f   :  { %3581 = vmatpush1.bf16.msra.mxu0 %v4157_v56  ;;  %3753 = vmatpush1.bf16.msra.mxu1 %v4159_v57  ;;  %v4224_v56 = vcombine.high %v269_v50, %v273_v51  ;;  %v276_v57 = vld [vmem:[#allocation6 + $0x590] sm:$0xff] }
 0x170   :  { %3582 = vmatprep.subr.bf16.mxu0 %v4166_v59  ;;  %3754 = vmatprep.subr.bf16.mxu1 %v4168_v60  ;;  %v280_v59 = vld [vmem:[#allocation6 + $0x5b0] sm:$0xff]  ;;  %v277_v60 = vld [vmem:[#allocation6 + $0x598] sm:$0xff] }
 0x171   :  { %v4230_v0 = vcombine.high %v276_v57, %v280_v59  ;;  %v4229_v7 = vcombine.low %v276_v57, %v280_v59  ;;  %v4231_v8 = vcombine.low %v277_v60, %v281_v61  ;;  %v337_v57 = vld [vmem:[#allocation6 + $0x778] sm:$0xff] }
 0x173   :  { %3583 = vmatpush1.bf16.msra.mxu0 %v4165_v2  ;;  %3755 = vmatpush1.bf16.msra.mxu1 %v4167_v3  ;;  %v4232_v2 = vcombine.high %v277_v60, %v281_v61  ;;  %v284_v3 = vld [vmem:[#allocation6 + $0x5d0] sm:$0xff] }
 0x174   :  { %3584 = vmatprep.subr.bf16.mxu0 %v4174_v4  ;;  %3756 = vmatprep.subr.bf16.mxu1 %v4176_v5  ;;  %v288_v4 = vld [vmem:[#allocation6 + $0x5f0] sm:$0xff]  ;;  %v285_v5 = vld [vmem:[#allocation6 + $0x5d8] sm:$0xff] }
 0x175   :  { %v4238_v9 = vcombine.high %v284_v3, %v288_v4  ;;  %v4237_v13 = vcombine.low %v284_v3, %v288_v4  ;;  %v4239_v14 = vcombine.low %v285_v5, %v289_v6  ;;  %v345_v3 = vld [vmem:[#allocation6 + $0x7b8] sm:$0xff] }
 0x177   :  { %3585 = vmatpush1.bf16.msra.mxu0 %v4173_v10  ;;  %3757 = vmatpush1.bf16.msra.mxu1 %v4175_v11  ;;  %v4240_v10 = vcombine.high %v285_v5, %v289_v6  ;;  %v292_v11 = vld [vmem:[#allocation6 + $0x610] sm:$0xff] }
 0x178   :  { %3597 = vmatprep.subr.bf16.mxu0 %v4182_v45  ;;  %3769 = vmatprep.subr.bf16.mxu1 %v4184_v46  ;;  %v296_v45 = vld [vmem:[#allocation6 + $0x630] sm:$0xff]  ;;  %v293_v46 = vld [vmem:[#allocation6 + $0x618] sm:$0xff] }
 0x179   :  { %v4246_v16 = vcombine.high %v292_v11, %v296_v45  ;;  %v4245_v24 = vcombine.low %v292_v11, %v296_v45  ;;  %v353_v11 = vld [vmem:[#allocation6 + $0x7f8] sm:$0xff] }
 0x17a   :  { %3587 = vmatmul.mubr.bf16.vlgmr.msra.gmra.mrb[4].mxu0 %v4794_v15  ;;  %3759 = vmatmul.mubr.bf16.vlgmr.msra.gmra.mrb[4].mxu1 %v4794_v15  ;;  %v4199_v15 = vcombine.low %v245_v53, %v249_v54  ;;  %v4247_v53 = vcombine.low %v293_v46, %v297_v12 }
 0x17b   :  { %3598 = vmatpush1.bf16.msra.mxu0 %v4181_v19  ;;  %3770 = vmatpush1.bf16.msra.mxu1 %v4183_v20  ;;  %v4248_v19 = vcombine.high %v293_v46, %v297_v12  ;;  %v300_v20 = vld [vmem:[#allocation6 + $0x650] sm:$0xff] }
 0x17c   :  { %3599 = vmatprep.subr.bf16.mxu0 %v4190_v21  ;;  %3771 = vmatprep.subr.bf16.mxu1 %v4192_v22  ;;  %v304_v21 = vld [vmem:[#allocation6 + $0x670] sm:$0xff]  ;;  %v301_v22 = vld [vmem:[#allocation6 + $0x658] sm:$0xff] }
 0x17d   :  { %3629 = vmatprep.mubr.bf16.mxu0 %v4802_v25  ;;  %3801 = vmatprep.mubr.bf16.mxu1 %v4802_v25  ;;  %v4216_v25 = vcombine.high %v261_v40, %v265_v41  ;;  %v4254_v54 = vcombine.high %v300_v20, %v304_v21  ;;  %v4253_v58 = vcombine.low %v300_v20, %v304_v21  ;;  %v361_v20 = vld [vmem:[#allocation6 + $0x838] sm:$0xff] }
 0x17e   :  { %v4255_v34 = vcombine.low %v301_v22, %v305_v23 }
 0x17f   :  { %3600 = vmatpush1.bf16.msra.mxu0 %v4189_v26  ;;  %3772 = vmatpush1.bf16.msra.mxu1 %v4191_v28  ;;  %v4256_v26 = vcombine.high %v301_v22, %v305_v23  ;;  %v308_v28 = vld [vmem:[#allocation6 + $0x690] sm:$0xff] }
 0x180   :  { %3601 = vmatprep.subr.bf16.mxu0 %v4198_v31  ;;  %3773 = vmatprep.subr.bf16.mxu1 %v4200_v32  ;;  %v312_v31 = vld [vmem:[#allocation6 + $0x6b0] sm:$0xff]  ;;  %v309_v32 = vld [vmem:[#allocation6 + $0x698] sm:$0xff] }
 0x181   :  { %v4262_v35 = vcombine.high %v308_v28, %v312_v31  ;;  %v4261_v39 = vcombine.low %v308_v28, %v312_v31  ;;  %v4263_v40 = vcombine.low %v309_v32, %v313_v33  ;;  %v369_v28 = vld [vmem:[#allocation6 + $0x878] sm:$0xff] }
 0x183   :  { %3602 = vmatpush1.bf16.msra.mxu0 %v4197_v36  ;;  %3774 = vmatpush1.bf16.msra.mxu1 %v4199_v15  ;;  %v4264_v36 = vcombine.high %v309_v32, %v313_v33  ;;  %v316_v15 = vld [vmem:[#allocation6 + $0x6d0] sm:$0xff] }
 0x184   :  { %3603 = vmatprep.subr.bf16.mxu0 %v4206_v17  ;;  %3775 = vmatprep.subr.bf16.mxu1 %v4208_v18  ;;  %v320_v17 = vld [vmem:[#allocation6 + $0x6f0] sm:$0xff]  ;;  %v317_v18 = vld [vmem:[#allocation6 + $0x6d8] sm:$0xff] }
 0x185   :  { %v4270_v41 = vcombine.high %v316_v15, %v320_v17  ;;  %v4269_v49 = vcombine.low %v316_v15, %v320_v17  ;;  %v4271_v50 = vcombine.low %v317_v18, %v321_v38  ;;  %v377_v15 = vld [vmem:[#allocation6 + $0x8b8] sm:$0xff] }
 0x187   :  { %3604 = vmatpush1.bf16.msra.mxu0 %v4205_v42  ;;  %3776 = vmatpush1.bf16.msra.mxu1 %v4207_v44  ;;  %v4272_v42 = vcombine.high %v317_v18, %v321_v38  ;;  %v324_v44 = vld [vmem:[#allocation6 + $0x710] sm:$0xff] }
 0x188   :  { %3605 = vmatprep.subr.bf16.mxu0 %v4214_v47  ;;  %3777 = vmatprep.subr.bf16.mxu1 %v4216_v25  ;;  %v328_v47 = vld [vmem:[#allocation6 + $0x730] sm:$0xff]  ;;  %v325_v25 = vld [vmem:[#allocation6 + $0x718] sm:$0xff] }
 0x189   :  { %v4278_v51 = vcombine.high %v324_v44, %v328_v47  ;;  %v4277_v59 = vcombine.low %v324_v44, %v328_v47  ;;  %v4279_v60 = vcombine.low %v325_v25, %v329_v48  ;;  %v385_v44 = vld [vmem:[#allocation6 + $0x8f8] sm:$0xff] }
 0x18b   :  { %3606 = vmatpush1.bf16.msra.mxu0 %v4213_v52  ;;  %3778 = vmatpush1.bf16.msra.mxu1 %v4215_v29  ;;  %v4280_v52 = vcombine.high %v325_v25, %v329_v48  ;;  %v332_v29 = vld [vmem:[#allocation6 + $0x750] sm:$0xff] }
 0x18c   :  { %3607 = vmatprep.subr.bf16.mxu0 %v4222_v30  ;;  %3779 = vmatprep.subr.bf16.mxu1 %v4224_v56  ;;  %v336_v30 = vld [vmem:[#allocation6 + $0x770] sm:$0xff]  ;;  %v333_v56 = vld [vmem:[#allocation6 + $0x758] sm:$0xff] }
 0x18d   :  { %v4286_v61 = vcombine.high %v332_v29, %v336_v30  ;;  %v4285_v4 = vcombine.low %v332_v29, %v336_v30  ;;  %v4287_v5 = vcombine.low %v333_v56, %v337_v57 }
 0x18f   :  { %3608 = vmatpush1.bf16.msra.mxu0 %v4221_v62  ;;  %3780 = vmatpush1.bf16.msra.mxu1 %v4223_v63  ;;  %v4288_v62 = vcombine.high %v333_v56, %v337_v57  ;;  %v340_v63 = vld [vmem:[#allocation6 + $0x790] sm:$0xff] }
 0x190   :  { %3609 = vmatprep.subr.bf16.mxu0 %v4230_v0  ;;  %3781 = vmatprep.subr.bf16.mxu1 %v4232_v2  ;;  %v344_v0 = vld [vmem:[#allocation6 + $0x7b0] sm:$0xff]  ;;  %v341_v2 = vld [vmem:[#allocation6 + $0x798] sm:$0xff] }
 0x191   :  { %v4294_v6 = vcombine.high %v340_v63, %v344_v0  ;;  %v4293_v45 = vcombine.low %v340_v63, %v344_v0  ;;  %v4295_v46 = vcombine.low %v341_v2, %v345_v3  ;;  %v396_v57 = vld [vmem:[#allocation6 + $0x950] sm:$0xff] }
 0x193   :  { %3610 = vmatpush1.bf16.msra.mxu0 %v4229_v7  ;;  %3782 = vmatpush1.bf16.msra.mxu1 %v4231_v8  ;;  %v4296_v7 = vcombine.high %v341_v2, %v345_v3  ;;  %v348_v8 = vld [vmem:[#allocation6 + $0x7d0] sm:$0xff] }
 0x194   :  { %3611 = vmatprep.subr.bf16.mxu0 %v4238_v9  ;;  %3783 = vmatprep.subr.bf16.mxu1 %v4240_v10  ;;  %v352_v9 = vld [vmem:[#allocation6 + $0x7f0] sm:$0xff]  ;;  %v349_v10 = vld [vmem:[#allocation6 + $0x7d8] sm:$0xff] }
 0x195   :  { %v4302_v12 = vcombine.high %v348_v8, %v352_v9  ;;  %v4301_v21 = vcombine.low %v348_v8, %v352_v9  ;;  %v4303_v22 = vcombine.low %v349_v10, %v353_v11  ;;  %v404_v3 = vld [vmem:[#allocation6 + $0x990] sm:$0xff] }
 0x197   :  { %3612 = vmatpush1.bf16.msra.mxu0 %v4237_v13  ;;  %3784 = vmatpush1.bf16.msra.mxu1 %v4239_v14  ;;  %v4304_v13 = vcombine.high %v349_v10, %v353_v11  ;;  %v356_v14 = vld [vmem:[#allocation6 + $0x810] sm:$0xff] }
 0x198   :  { %3613 = vmatprep.subr.bf16.mxu0 %v4246_v16  ;;  %3785 = vmatprep.subr.bf16.mxu1 %v4248_v19  ;;  %v360_v16 = vld [vmem:[#allocation6 + $0x830] sm:$0xff]  ;;  %v357_v19 = vld [vmem:[#allocation6 + $0x818] sm:$0xff] }
 0x199   :  { %v4310_v23 = vcombine.high %v356_v14, %v360_v16  ;;  %v4309_v31 = vcombine.low %v356_v14, %v360_v16  ;;  %v4311_v32 = vcombine.low %v357_v19, %v361_v20  ;;  %v412_v11 = vld [vmem:[#allocation6 + $0x9d0] sm:$0xff] }
 0x19b   :  { %3614 = vmatpush1.bf16.msra.mxu0 %v4245_v24  ;;  %3786 = vmatpush1.bf16.msra.mxu1 %v4247_v53  ;;  %v4312_v24 = vcombine.high %v357_v19, %v361_v20  ;;  %v364_v53 = vld [vmem:[#allocation6 + $0x850] sm:$0xff] }
 0x19c   :  { %3615 = vmatprep.subr.bf16.mxu0 %v4254_v54  ;;  %3787 = vmatprep.subr.bf16.mxu1 %v4256_v26  ;;  %v368_v54 = vld [vmem:[#allocation6 + $0x870] sm:$0xff]  ;;  %v365_v26 = vld [vmem:[#allocation6 + $0x858] sm:$0xff] }
 0x19d   :  { %v4318_v33 = vcombine.high %v364_v53, %v368_v54  ;;  %v4317_v17 = vcombine.low %v364_v53, %v368_v54  ;;  %v4319_v18 = vcombine.low %v365_v26, %v369_v28  ;;  %v420_v20 = vld [vmem:[#allocation6 + $0xa10] sm:$0xff] }
 0x19f   :  { %3616 = vmatpush1.bf16.msra.mxu0 %v4253_v58  ;;  %3788 = vmatpush1.bf16.msra.mxu1 %v4255_v34  ;;  %v4320_v58 = vcombine.high %v365_v26, %v369_v28  ;;  %v372_v34 = vld [vmem:[#allocation6 + $0x890] sm:$0xff] }
 0x1a0   :  { %3617 = vmatprep.subr.bf16.mxu0 %v4262_v35  ;;  %3789 = vmatprep.subr.bf16.mxu1 %v4264_v36  ;;  %v376_v35 = vld [vmem:[#allocation6 + $0x8b0] sm:$0xff]  ;;  %v373_v36 = vld [vmem:[#allocation6 + $0x898] sm:$0xff] }
 0x1a1   :  { %v4326_v38 = vcombine.high %v372_v34, %v376_v35  ;;  %v4325_v47 = vcombine.low %v372_v34, %v376_v35  ;;  %v428_v28 = vld [vmem:[#allocation6 + $0xa50] sm:$0xff] }
 0x1a3   :  { %3618 = vmatpush1.bf16.msra.mxu0 %v4261_v39  ;;  %3790 = vmatpush1.bf16.msra.mxu1 %v4263_v40  ;;  %v4328_v39 = vcombine.high %v373_v36, %v377_v15  ;;  %v380_v40 = vld [vmem:[#allocation6 + $0x8d0] sm:$0xff] }
 0x1a4   :  { %3619 = vmatprep.subr.bf16.mxu0 %v4270_v41  ;;  %3791 = vmatprep.subr.bf16.mxu1 %v4272_v42  ;;  %v384_v41 = vld [vmem:[#allocation6 + $0x8f0] sm:$0xff]  ;;  %v381_v42 = vld [vmem:[#allocation6 + $0x8d8] sm:$0xff] }
 0x1a5   :  { %v4334_v25 = vcombine.high %v380_v40, %v384_v41  ;;  %v4336_v48 = vcombine.high %v381_v42, %v385_v44  ;;  %v4333_v29 = vcombine.low %v380_v40, %v384_v41  ;;  %v4335_v30 = vcombine.low %v381_v42, %v385_v44  ;;  %v444_v44 = vld [vmem:[#allocation6 + $0xad0] sm:$0xff] }
 0x1a7   :  { %3620 = vmatpush1.bf16.msra.mxu0 %v4269_v49  ;;  %3792 = vmatpush1.bf16.msra.mxu1 %v4271_v50  ;;  %v388_v49 = vld [vmem:[#allocation6 + $0x910] sm:$0xff] }
 0x1a8   :  { %3621 = vmatprep.subr.bf16.mxu0 %v4278_v51  ;;  %3793 = vmatprep.subr.bf16.mxu1 %v4280_v52  ;;  %v392_v50 = vld [vmem:[#allocation6 + $0x930] sm:$0xff]  ;;  %v389_v51 = vld [vmem:[#allocation6 + $0x918] sm:$0xff] }
 0x1a9   :  { %v393_v52 = vld [vmem:[#allocation6 + $0x938] sm:$0xff]  ;;  %v4342_v56 = vcombine.high %v388_v49, %v392_v50 }
 0x1aa   :  { %v4343_v63 = vcombine.low %v389_v51, %v393_v52 }
 0x1ab   :  { %3622 = vmatpush1.bf16.msra.mxu0 %v4277_v59  ;;  %3794 = vmatpush1.bf16.msra.mxu1 %v4279_v60  ;;  %v400_v59 = vld [vmem:[#allocation6 + $0x970] sm:$0xff]  ;;  %v397_v60 = vld [vmem:[#allocation6 + $0x958] sm:$0xff] }
 0x1ac   :  { %3623 = vmatprep.subr.bf16.mxu0 %v4286_v61  ;;  %3795 = vmatprep.subr.bf16.mxu1 %v4288_v62  ;;  %v401_v61 = vld [vmem:[#allocation6 + $0x978] sm:$0xff]  ;;  %v4341_v62 = vcombine.low %v388_v49, %v392_v50  ;;  %v4350_v0 = vcombine.high %v396_v57, %v400_v59 }
 0x1ad   :  { %v4352_v2 = vcombine.high %v397_v60, %v401_v61  ;;  %v4351_v8 = vcombine.low %v397_v60, %v401_v61  ;;  %v460_v61 = vld [vmem:[#allocation6 + $0xb50] sm:$0xff] }
 0x1af   :  { %3624 = vmatpush1.bf16.msra.mxu0 %v4285_v4  ;;  %3796 = vmatpush1.bf16.msra.mxu1 %v4287_v5  ;;  %v408_v4 = vld [vmem:[#allocation6 + $0x9b0] sm:$0xff]  ;;  %v405_v5 = vld [vmem:[#allocation6 + $0x998] sm:$0xff] }
 0x1b0   :  { %3625 = vmatprep.subr.bf16.mxu0 %v4294_v6  ;;  %3797 = vmatprep.subr.bf16.mxu1 %v4296_v7  ;;  %v409_v6 = vld [vmem:[#allocation6 + $0x9b8] sm:$0xff]  ;;  %v4349_v7 = vcombine.low %v396_v57, %v400_v59  ;;  %v4358_v9 = vcombine.high %v404_v3, %v408_v4 }
 0x1b1   :  { %v4360_v10 = vcombine.high %v405_v5, %v409_v6  ;;  %v4359_v14 = vcombine.low %v405_v5, %v409_v6  ;;  %v468_v6 = vld [vmem:[#allocation6 + $0xb90] sm:$0xff] }
 0x1b3   :  { %3626 = vmatpush1.bf16.msra.mxu0 %v4293_v45  ;;  %3798 = vmatpush1.bf16.msra.mxu1 %v4295_v46  ;;  %v416_v45 = vld [vmem:[#allocation6 + $0x9f0] sm:$0xff]  ;;  %v413_v46 = vld [vmem:[#allocation6 + $0x9d8] sm:$0xff] }
 0x1b4   :  { %3627 = vmatprep.subr.bf16.mxu0 %v4302_v12  ;;  %3799 = vmatprep.subr.bf16.mxu1 %v4304_v13  ;;  %v417_v12 = vld [vmem:[#allocation6 + $0x9f8] sm:$0xff]  ;;  %v4357_v13 = vcombine.low %v404_v3, %v408_v4  ;;  %v4366_v16 = vcombine.high %v412_v11, %v416_v45 }
 0x1b5   :  { %v4368_v19 = vcombine.high %v413_v46, %v417_v12  ;;  %v4367_v53 = vcombine.low %v413_v46, %v417_v12  ;;  %v476_v12 = vld [vmem:[#allocation6 + $0xbd0] sm:$0xff] }
 0x1b7   :  { %3628 = vmatpush1.bf16.msra.mxu0 %v4301_v21  ;;  %3800 = vmatpush1.bf16.msra.mxu1 %v4303_v22  ;;  %v424_v21 = vld [vmem:[#allocation6 + $0xa30] sm:$0xff]  ;;  %v421_v22 = vld [vmem:[#allocation6 + $0xa18] sm:$0xff] }
 0x1b8   :  { %3640 = vmatprep.subr.bf16.mxu0 %v4310_v23  ;;  %3812 = vmatprep.subr.bf16.mxu1 %v4312_v24  ;;  %v425_v23 = vld [vmem:[#allocation6 + $0xa38] sm:$0xff]  ;;  %v4365_v24 = vcombine.low %v412_v11, %v416_v45  ;;  %v4374_v54 = vcombine.high %v420_v20, %v424_v21 }
 0x1b9   :  { %v4376_v26 = vcombine.high %v421_v22, %v425_v23  ;;  %v4375_v34 = vcombine.low %v421_v22, %v425_v23  ;;  %v484_v23 = vld [vmem:[#allocation6 + $0xc10] sm:$0xff] }
 0x1ba   :  { %3630 = vmatmul.mubr.bf16.vlgmr.msra.gmra.mrb[4].mxu0 %v4810_v27  ;;  %3802 = vmatmul.mubr.bf16.vlgmr.msra.gmra.mrb[4].mxu1 %v4810_v27  ;;  %v4327_v27 = vcombine.low %v373_v36, %v377_v15  ;;  %v436_v15 = vld [vmem:[#allocation6 + $0xa90] sm:$0xff] }
 0x1bb   :  { %3641 = vmatpush1.bf16.msra.mxu0 %v4309_v31  ;;  %3813 = vmatpush1.bf16.msra.mxu1 %v4311_v32  ;;  %v432_v31 = vld [vmem:[#allocation6 + $0xa70] sm:$0xff]  ;;  %v429_v32 = vld [vmem:[#allocation6 + $0xa58] sm:$0xff] }
 0x1bc   :  { %3642 = vmatprep.subr.bf16.mxu0 %v4318_v33  ;;  %3814 = vmatprep.subr.bf16.mxu1 %v4320_v58  ;;  %v433_v33 = vld [vmem:[#allocation6 + $0xa78] sm:$0xff]  ;;  %v4373_v58 = vcombine.low %v420_v20, %v424_v21  ;;  %v4382_v35 = vcombine.high %v428_v28, %v432_v31 }
 0x1bd   :  { %3672 = vmatprep.mubr.bf16.mxu0 %v4818_v37  ;;  %3844 = vmatprep.mubr.bf16.mxu1 %v4818_v37  ;;  %v4344_v37 = vcombine.high %v389_v51, %v393_v52  ;;  %v4384_v36 = vcombine.high %v429_v32, %v433_v33  ;;  %v4383_v40 = vcombine.low %v429_v32, %v433_v33  ;;  %v452_v52 = vld [vmem:[#allocation6 + $0xb10] sm:$0xff] }
 0x1be   :  { %v492_v33 = vld [vmem:[#allocation6 + $0xc50] sm:$0xff] }
 0x1bf   :  { %3643 = vmatpush1.bf16.msra.mxu0 %v4317_v17  ;;  %3815 = vmatpush1.bf16.msra.mxu1 %v4319_v18  ;;  %v440_v17 = vld [vmem:[#allocation6 + $0xab0] sm:$0xff]  ;;  %v437_v18 = vld [vmem:[#allocation6 + $0xa98] sm:$0xff] }
 0x1c0   :  { %3644 = vmatprep.subr.bf16.mxu0 %v4326_v38  ;;  %3816 = vmatprep.subr.bf16.mxu1 %v4328_v39  ;;  %v441_v38 = vld [vmem:[#allocation6 + $0xab8] sm:$0xff]  ;;  %v4381_v39 = vcombine.low %v428_v28, %v432_v31  ;;  %v4390_v41 = vcombine.high %v436_v15, %v440_v17 }
 0x1c1   :  { %v4392_v42 = vcombine.high %v437_v18, %v441_v38  ;;  %v4391_v49 = vcombine.low %v437_v18, %v441_v38  ;;  %v500_v38 = vld [vmem:[#allocation6 + $0xc90] sm:$0xff] }
 0x1c3   :  { %3645 = vmatpush1.bf16.msra.mxu0 %v4325_v47  ;;  %3817 = vmatpush1.bf16.msra.mxu1 %v4327_v27  ;;  %v448_v47 = vld [vmem:[#allocation6 + $0xaf0] sm:$0xff]  ;;  %v445_v27 = vld [vmem:[#allocation6 + $0xad8] sm:$0xff] }
 0x1c4   :  { %3646 = vmatprep.subr.bf16.mxu0 %v4334_v25  ;;  %3818 = vmatprep.subr.bf16.mxu1 %v4336_v48  ;;  %v449_v25 = vld [vmem:[#allocation6 + $0xaf8] sm:$0xff]  ;;  %v4389_v48 = vcombine.low %v436_v15, %v440_v17  ;;  %v4398_v50 = vcombine.high %v444_v44, %v448_v47 }
 0x1c5   :  { %v4400_v51 = vcombine.high %v445_v27, %v449_v25  ;;  %v4399_v57 = vcombine.low %v445_v27, %v449_v25  ;;  %v508_v25 = vld [vmem:[#allocation6 + $0xcd0] sm:$0xff] }
 0x1c7   :  { %3647 = vmatpush1.bf16.msra.mxu0 %v4333_v29  ;;  %3819 = vmatpush1.bf16.msra.mxu1 %v4335_v30  ;;  %v456_v29 = vld [vmem:[#allocation6 + $0xb30] sm:$0xff]  ;;  %v453_v30 = vld [vmem:[#allocation6 + $0xb18] sm:$0xff] }
 0x1c8   :  { %3648 = vmatprep.subr.bf16.mxu0 %v4342_v56  ;;  %3820 = vmatprep.subr.bf16.mxu1 %v4344_v37  ;;  %v457_v56 = vld [vmem:[#allocation6 + $0xb38] sm:$0xff]  ;;  %v4397_v37 = vcombine.low %v444_v44, %v448_v47  ;;  %v4406_v59 = vcombine.high %v452_v52, %v456_v29 }
 0x1c9   :  { %v4408_v60 = vcombine.high %v453_v30, %v457_v56  ;;  %v4407_v3 = vcombine.low %v453_v30, %v457_v56  ;;  %v516_v56 = vld [vmem:[#allocation6 + $0xd10] sm:$0xff] }
 0x1cb   :  { %3649 = vmatpush1.bf16.msra.mxu0 %v4341_v62  ;;  %3821 = vmatpush1.bf16.msra.mxu1 %v4343_v63  ;;  %v464_v62 = vld [vmem:[#allocation6 + $0xb70] sm:$0xff]  ;;  %v461_v63 = vld [vmem:[#allocation6 + $0xb58] sm:$0xff] }
 0x1cc   :  { %3650 = vmatprep.subr.bf16.mxu0 %v4350_v0  ;;  %3822 = vmatprep.subr.bf16.mxu1 %v4352_v2  ;;  %v465_v0 = vld [vmem:[#allocation6 + $0xb78] sm:$0xff]  ;;  %v4405_v2 = vcombine.low %v452_v52, %v456_v29  ;;  %v4414_v4 = vcombine.high %v460_v61, %v464_v62 }
 0x1cd   :  { %v4416_v5 = vcombine.high %v461_v63, %v465_v0  ;;  %v4415_v11 = vcombine.low %v461_v63, %v465_v0  ;;  %v524_v0 = vld [vmem:[#allocation6 + $0xd50] sm:$0xff] }
 0x1cf   :  { %3651 = vmatpush1.bf16.msra.mxu0 %v4349_v7  ;;  %3823 = vmatpush1.bf16.msra.mxu1 %v4351_v8  ;;  %v472_v7 = vld [vmem:[#allocation6 + $0xbb0] sm:$0xff]  ;;  %v469_v8 = vld [vmem:[#allocation6 + $0xb98] sm:$0xff] }
 0x1d0   :  { %3652 = vmatprep.subr.bf16.mxu0 %v4358_v9  ;;  %3824 = vmatprep.subr.bf16.mxu1 %v4360_v10  ;;  %v473_v9 = vld [vmem:[#allocation6 + $0xbb8] sm:$0xff]  ;;  %v4413_v10 = vcombine.low %v460_v61, %v464_v62  ;;  %v4422_v45 = vcombine.high %v468_v6, %v472_v7 }
 0x1d1   :  { %v4424_v46 = vcombine.high %v469_v8, %v473_v9  ;;  %v4423_v20 = vcombine.low %v469_v8, %v473_v9 }
 0x1d3   :  { %3653 = vmatpush1.bf16.msra.mxu0 %v4357_v13  ;;  %3825 = vmatpush1.bf16.msra.mxu1 %v4359_v14  ;;  %v480_v13 = vld [vmem:[#allocation6 + $0xbf0] sm:$0xff]  ;;  %v477_v14 = vld [vmem:[#allocation6 + $0xbd8] sm:$0xff] }
 0x1d4   :  { %3654 = vmatprep.subr.bf16.mxu0 %v4366_v16  ;;  %3826 = vmatprep.subr.bf16.mxu1 %v4368_v19  ;;  %v481_v16 = vld [vmem:[#allocation6 + $0xbf8] sm:$0xff]  ;;  %v4421_v19 = vcombine.low %v468_v6, %v472_v7  ;;  %v4430_v21 = vcombine.high %v476_v12, %v480_v13  ;;  %v4863_v7 = vld [vmem:[#allocation8] sm:$0xff] }
 0x1d5   :  { %v4432_v22 = vcombine.high %v477_v14, %v481_v16  ;;  %v4431_v28 = vcombine.low %v477_v14, %v481_v16  ;;  %v533_v16 = vld [vmem:[#allocation6 + $0xd98] sm:$0xff] }
 0x1d7   :  { %3655 = vmatpush1.bf16.msra.mxu0 %v4365_v24  ;;  %3827 = vmatpush1.bf16.msra.mxu1 %v4367_v53  ;;  %v488_v24 = vld [vmem:[#allocation6 + $0xc30] sm:$0xff]  ;;  %v485_v53 = vld [vmem:[#allocation6 + $0xc18] sm:$0xff] }
 0x1d8   :  { %3656 = vmatprep.subr.bf16.mxu0 %v4374_v54  ;;  %3828 = vmatprep.subr.bf16.mxu1 %v4376_v26  ;;  %v489_v54 = vld [vmem:[#allocation6 + $0xc38] sm:$0xff]  ;;  %v4429_v26 = vcombine.low %v476_v12, %v480_v13  ;;  %v4438_v31 = vcombine.high %v484_v23, %v488_v24  ;;  %v532_v12 = vld [vmem:[#allocation6 + $0xd90] sm:$0xff] }
 0x1d9   :  { %v4440_v32 = vcombine.high %v485_v53, %v489_v54  ;;  %v4439_v15 = vcombine.low %v485_v53, %v489_v54  ;;  %v536_v13 = vld [vmem:[#allocation6 + $0xdb0] sm:$0xff] }
 0x1da   :  { %v4486_v53 = vcombine.high %v532_v12, %v536_v13 }
 0x1db   :  { %3657 = vmatpush1.bf16.msra.mxu0 %v4373_v58  ;;  %3829 = vmatpush1.bf16.msra.mxu1 %v4375_v34  ;;  %v496_v58 = vld [vmem:[#allocation6 + $0xc70] sm:$0xff]  ;;  %v493_v34 = vld [vmem:[#allocation6 + $0xc58] sm:$0xff] }
 0x1dc   :  { %3658 = vmatprep.subr.bf16.mxu0 %v4382_v35  ;;  %3830 = vmatprep.subr.bf16.mxu1 %v4384_v36  ;;  %v497_v35 = vld [vmem:[#allocation6 + $0xc78] sm:$0xff]  ;;  %v4437_v36 = vcombine.low %v484_v23, %v488_v24  ;;  %v4446_v17 = vcombine.high %v492_v33, %v496_v58 }
 0x1dd   :  { %v4448_v18 = vcombine.high %v493_v34, %v497_v35  ;;  %v4447_v44 = vcombine.low %v493_v34, %v497_v35  ;;  %v541_v34 = vld [vmem:[#allocation6 + $0xdd8] sm:$0xff] }
 0x1de   :  { %v545_v35 = vld [vmem:[#allocation6 + $0xdf8] sm:$0xff] }
 0x1df   :  { %3659 = vmatpush1.bf16.msra.mxu0 %v4381_v39  ;;  %3831 = vmatpush1.bf16.msra.mxu1 %v4383_v40  ;;  %v504_v39 = vld [vmem:[#allocation6 + $0xcb0] sm:$0xff]  ;;  %v501_v40 = vld [vmem:[#allocation6 + $0xc98] sm:$0xff] }
 0x1e0   :  { %3660 = vmatprep.subr.bf16.mxu0 %v4390_v41  ;;  %3832 = vmatprep.subr.bf16.mxu1 %v4392_v42  ;;  %v505_v41 = vld [vmem:[#allocation6 + $0xcb8] sm:$0xff]  ;;  %v4445_v42 = vcombine.low %v492_v33, %v496_v58  ;;  %v4454_v47 = vcombine.high %v500_v38, %v504_v39  ;;  %v4453_v52 = vcombine.low %v500_v38, %v504_v39 }
 0x1e1   :  { %v4456_v27 = vcombine.high %v501_v40, %v505_v41  ;;  %v4485_v38 = vcombine.low %v532_v12, %v536_v13  ;;  %v576_v12 = vld [vmem:[#allocation6 + $0xef0] sm:$0xff]  ;;  %v573_v13 = vld [vmem:[#allocation6 + $0xed8] sm:$0xff] }
 0x1e3   :  { %3661 = vmatpush1.bf16.msra.mxu0 %v4389_v48  ;;  %3833 = vmatpush1.bf16.msra.mxu1 %v4391_v49  ;;  %v512_v48 = vld [vmem:[#allocation6 + $0xcf0] sm:$0xff]  ;;  %v509_v49 = vld [vmem:[#allocation6 + $0xcd8] sm:$0xff] }
 0x1e4   :  { %3662 = vmatprep.subr.bf16.mxu0 %v4398_v50  ;;  %3834 = vmatprep.subr.bf16.mxu1 %v4400_v51  ;;  %v513_v50 = vld [vmem:[#allocation6 + $0xcf8] sm:$0xff]  ;;  %v3951_v51 = vlaneseq  ;;  %v4462_v29 = vcombine.high %v508_v25, %v512_v48  ;;  %v4461_v61 = vcombine.low %v508_v25, %v512_v48 }
 0x1e5   :  { %v4464_v30 = vcombine.high %v509_v49, %v513_v50  ;;  %v4463_v62 = vcombine.low %v509_v49, %v513_v50  ;;  %v4496_v49 = vcombine.high %v541_v34, %v545_v35  ;;  %v548_v50 = vld [vmem:[#allocation6 + $0xe10] sm:$0xff] }
 0x1e7   :  { %3663 = vmatpush1.bf16.msra.mxu0 %v4397_v37  ;;  %3835 = vmatpush1.bf16.msra.mxu1 %v4399_v57  ;;  %v520_v37 = vld [vmem:[#allocation6 + $0xd30] sm:$0xff]  ;;  %v517_v57 = vld [vmem:[#allocation6 + $0xd18] sm:$0xff] }
 0x1e8   :  { %3664 = vmatprep.subr.bf16.mxu0 %v4406_v59  ;;  %3836 = vmatprep.subr.bf16.mxu1 %v4408_v60  ;;  %v521_v59 = vld [vmem:[#allocation6 + $0xd38] sm:$0xff]  ;;  %v4860_v60 = vshrl.u32 %v3951_v51, 7  ;;  %v4469_v6 = vcombine.low %v516_v56, %v520_v37  ;;  %v552_v51 = vld [vmem:[#allocation6 + $0xe30] sm:$0xff] }
 0x1e9   :  { %v4472_v63 = vcombine.high %v517_v57, %v521_v59 }
 0x1ea   :  { %v3961_v8 = vsub.s32 2, %v4860_v60  ;;  %v3957_v9 = vsub.s32 1, %v4860_v60 }
 0x1eb   :  { %3665 = vmatpush1.bf16.msra.mxu0 %v4405_v2  ;;  %3837 = vmatpush1.bf16.msra.mxu1 %v4407_v3  ;;  %v528_v2 = vld [vmem:[#allocation6 + $0xd70] sm:$0xff]  ;;  %v3953_v3 = vsub.s32 0, %v4860_v60 }
 0x1ec   :  { %3666 = vmatprep.subr.bf16.mxu0 %v4414_v4  ;;  %3838 = vmatprep.subr.bf16.mxu1 %v4416_v5  ;;  %v525_v4 = vld [vmem:[#allocation6 + $0xd58] sm:$0xff] }
 0x1ed   :  { %v529_v5 = vld [vmem:[#allocation6 + $0xd78] sm:$0xff]  ;;  %v3954_v14 = vrot.slane %v4863_v7, %v3953_v3 }
 0x1ee   :  { %v4479_v24 = vcombine.low %v525_v4, %v529_v5 }
 0x1ef   :  { %3667 = vmatpush1.bf16.msra.mxu0 %v4413_v10  ;;  %3839 = vmatpush1.bf16.msra.mxu1 %v4415_v11  ;;  %v4471_v10 = vcombine.low %v517_v57, %v521_v59  ;;  %v3965_v11 = vsub.s32 3, %v4860_v60  ;;  %v556_v59 = vld [vmem:[#allocation6 + $0xe50] sm:$0xff] }
 0x1f0   :  { %3668 = vmatprep.subr.bf16.mxu0 %v4422_v45  ;;  %3840 = vmatprep.subr.bf16.mxu1 %v4424_v46  ;;  %v4478_v45 = vcombine.high %v524_v0, %v528_v2  ;;  %v4480_v46 = vcombine.high %v525_v4, %v529_v5  ;;  %v564_v4 = vld [vmem:[#allocation6 + $0xe90] sm:$0xff] }
 0x1f1   :  { %v3966_v23 = vrot.slane %v4863_v7, %v3965_v11  ;;  %v568_v5 = vld [vmem:[#allocation6 + $0xeb0] sm:$0xff] }
 0x1f2   :  { %v4518_v11 = vcombine.high %v564_v4, %v568_v5 }
 0x1f3   :  { %3669 = vmatpush1.bf16.msra.mxu0 %v4421_v19  ;;  %3841 = vmatpush1.bf16.msra.mxu1 %v4423_v20  ;;  %v537_v19 = vld [vmem:[#allocation6 + $0xdb8] sm:$0xff]  ;;  %v3962_v20 = vrot.slane %v4863_v7, %v3961_v8 }
 0x1f4   :  { %3670 = vmatprep.subr.bf16.mxu0 %v4430_v21  ;;  %3842 = vmatprep.subr.bf16.mxu1 %v4432_v22  ;;  %v3958_v21 = vrot.slane %v4863_v7, %v3957_v9  ;;  %v4477_v22 = vcombine.low %v524_v0, %v528_v2  ;;  %v4487_v39 = vcombine.low %v533_v16, %v537_v19  ;;  %v569_v8 = vld [vmem:[#allocation6 + $0xeb8] sm:$0xff] }
 0x1f7   :  { %3671 = vmatpush1.bf16.msra.mxu0 %v4429_v26  ;;  %3843 = vmatpush1.bf16.msra.mxu1 %v4431_v28  ;;  %v4488_v26 = vcombine.high %v533_v16, %v537_v19  ;;  %v540_v28 = vld [vmem:[#allocation6 + $0xdd0] sm:$0xff]  ;;  %v4517_v16 = vcombine.low %v564_v4, %v568_v5 }
 0x1f8   :  { %3683 = vmatprep.subr.bf16.mxu0 %v4438_v31  ;;  %3855 = vmatprep.subr.bf16.mxu1 %v4440_v32  ;;  %v544_v31 = vld [vmem:[#allocation6 + $0xdf0] sm:$0xff] }
 0x1fa   :  { %3673 = vmatmul.mubr.bf16.vlgmr.msra.gmra.mrb[4].mxu0 %v4826_v43  ;;  %3845 = vmatmul.mubr.bf16.vlgmr.msra.gmra.mrb[4].mxu1 %v4826_v43  ;;  %v4455_v43 = vcombine.low %v501_v40, %v505_v41 }
 0x1fb   :  { %3684 = vmatpush1.bf16.msra.mxu0 %v4437_v36  ;;  %3856 = vmatpush1.bf16.msra.mxu1 %v4439_v15 }
 0x1fc   :  { %3685 = vmatprep.subr.bf16.mxu0 %v4446_v17  ;;  %3857 = vmatprep.subr.bf16.mxu1 %v4448_v18 }
 0x1fd   :  { %3715 = vmatprep.mubr.bf16.mxu0 %v4834_v55  ;;  %3887 = vmatprep.mubr.bf16.mxu1 %v4834_v55  ;;  %v4470_v55 = vcombine.high %v516_v56, %v520_v37  ;;  %v4495_v56 = vcombine.low %v541_v34, %v545_v35  ;;  %v4502_v37 = vcombine.high %v548_v50, %v552_v51  ;;  %v593_v34 = vld [vmem:[#allocation6 + $0xf78] sm:$0xff] }
 0x1ff   :  { %3686 = vmatpush1.bf16.msra.mxu0 %v4445_v42  ;;  %3858 = vmatpush1.bf16.msra.mxu1 %v4447_v44 }
 0x200   :  { %3687 = vmatprep.subr.bf16.mxu0 %v4454_v47  ;;  %3859 = vmatprep.subr.bf16.mxu1 %v4456_v27  ;;  %v4494_v47 = vcombine.high %v540_v28, %v544_v31 }
 0x203   :  { %3688 = vmatpush1.bf16.msra.mxu0 %v4453_v52  ;;  %3860 = vmatpush1.bf16.msra.mxu1 %v4455_v43  ;;  %v549_v43 = vld [vmem:[#allocation6 + $0xe18] sm:$0xff] }
 0x204   :  { %3689 = vmatprep.subr.bf16.mxu0 %v4462_v29  ;;  %3861 = vmatprep.subr.bf16.mxu1 %v4464_v30  ;;  %v553_v29 = vld [vmem:[#allocation6 + $0xe38] sm:$0xff]  ;;  %v4493_v30 = vcombine.low %v540_v28, %v544_v31 }
 0x205   :  { %v4504_v57 = vcombine.high %v549_v43, %v553_v29  ;;  %v4503_v0 = vcombine.low %v549_v43, %v553_v29 }
 0x207   :  { %3690 = vmatpush1.bf16.msra.mxu0 %v4461_v61  ;;  %3862 = vmatpush1.bf16.msra.mxu1 %v4463_v62  ;;  %v560_v61 = vld [vmem:[#allocation6 + $0xe70] sm:$0xff]  ;;  %v557_v62 = vld [vmem:[#allocation6 + $0xe58] sm:$0xff] }
 0x208   :  { %3691 = vmatprep.subr.bf16.mxu0 %v4470_v55  ;;  %3863 = vmatprep.subr.bf16.mxu1 %v4472_v63  ;;  %v561_v55 = vld [vmem:[#allocation6 + $0xe78] sm:$0xff]  ;;  %v4501_v63 = vcombine.low %v548_v50, %v552_v51  ;;  %v4510_v2 = vcombine.high %v556_v59, %v560_v61  ;;  %v4509_v9 = vcombine.low %v556_v59, %v560_v61  ;;  %v3981_v59 = vsub.s32 7, %v4860_v60 }
 0x209   :  { %v4512_v3 = vcombine.high %v557_v62, %v561_v55 }
 0x20b   :  { %3692 = vmatpush1.bf16.msra.mxu0 %v4469_v6  ;;  %3864 = vmatpush1.bf16.msra.mxu1 %v4471_v10  ;;  %v565_v6 = vld [vmem:[#allocation6 + $0xe98] sm:$0xff]  ;;  %v4511_v10 = vcombine.low %v557_v62, %v561_v55 }
 0x20c   :  { %3693 = vmatprep.subr.bf16.mxu0 %v4478_v45  ;;  %3865 = vmatprep.subr.bf16.mxu1 %v4480_v46  ;;  %v4520_v45 = vcombine.high %v565_v6, %v569_v8  ;;  %v572_v46 = vld [vmem:[#allocation6 + $0xed0] sm:$0xff]  ;;  %v4519_v19 = vcombine.low %v565_v6, %v569_v8 }
 0x20d   :  { %v3373_v54 = vpop.f32.mrb[0].mxu0  ;;  %v3545_v33 = vpop.f32.mrb[0].mxu1 }
 0x20e   :  { %v3991_v32 = vadd.f32 %v3954_v14, %v3373_v54  ;;  %v3375_v58 = vpop.f32.mrb[1].mxu0  ;;  %v3993_v36 = vadd.f32 %v3962_v20, %v3545_v33  ;;  %v3547_v17 = vpop.f32.mrb[1].mxu1  ;;  %v4525_v54 = vcombine.low %v572_v46, %v576_v12  ;;  %v592_v33 = vld [vmem:[#allocation6 + $0xf70] sm:$0xff] }
 0x20f   :  { %v3992_v15 = vadd.f32 %v3958_v21, %v3375_v58  ;;  %v3377_v18 = vpop.f32.mrb[2].mxu0  ;;  %3694 = vmatpush1.bf16.msra.mxu0 %v4477_v22  ;;  %v3994_v40 = vadd.f32 %v3966_v23, %v3547_v17  ;;  %v3549_v42 = vpop.f32.mrb[2].mxu1  ;;  %3866 = vmatpush1.bf16.msra.mxu1 %v4479_v24  ;;  %v580_v22 = vld [vmem:[#allocation6 + $0xf10] sm:$0xff]  ;;  %v581_v24 = vld [vmem:[#allocation6 + $0xf18] sm:$0xff] }
 0x210   :  { %4007 = vst [vmem:[#allocation9] sm:$0xff] %v3991_v32  ;;  %v3999_v41 = vadd.f32 %v3954_v14, %v3377_v18  ;;  %v3379_v44 = vpop.f32.mrb[3].mxu0  ;;  %3695 = vmatprep.subr.bf16.mxu0 %v4486_v53  ;;  %4009 = vst [vmem:[#allocation9 + $0x10] sm:$0xff] %v3993_v36  ;;  %v4001_v27 = vadd.f32 %v3962_v20, %v3549_v42  ;;  %v3551_v48 = vpop.f32.mrb[3].mxu1  ;;  %3867 = vmatprep.subr.bf16.mxu1 %v4488_v26  ;;  %v577_v14 = vld [vmem:[#allocation6 + $0xef8] sm:$0xff]  ;;  %v588_v32 = vld [vmem:[#allocation6 + $0xf50] sm:$0xff] }
 0x211   :  { %4008 = vst [vmem:[#allocation9 + $0x8] sm:$0xff] %v3992_v15  ;;  %v4000_v25 = vadd.f32 %v3958_v21, %v3379_v44  ;;  %4010 = vst [vmem:[#allocation9 + $0x18] sm:$0xff] %v3994_v40  ;;  %v4002_v52 = vadd.f32 %v3966_v23, %v3551_v48  ;;  %v4526_v20 = vcombine.high %v572_v46, %v576_v12  ;;  %v584_v23 = vld [vmem:[#allocation6 + $0xf30] sm:$0xff]  ;;  %v585_v53 = vld [vmem:[#allocation6 + $0xf38] sm:$0xff] }
 0x212   :  { %4015 = vst [vmem:[#allocation9 + $0x40] sm:$0xff] %v3999_v41  ;;  %4017 = vst [vmem:[#allocation9 + $0x50] sm:$0xff] %v4001_v27  ;;  %v4528_v21 = vcombine.high %v573_v13, %v577_v14  ;;  %v4527_v26 = vcombine.low %v573_v13, %v577_v14  ;;  %v4534_v28 = vcombine.high %v580_v22, %v584_v23  ;;  %v589_v58 = vld [vmem:[#allocation6 + $0xf58] sm:$0xff]  ;;  %v596_v18 = vld [vmem:[#allocation6 + $0xf90] sm:$0xff] }
 0x213   :  { %4016 = vst [vmem:[#allocation9 + $0x48] sm:$0xff] %v4000_v25  ;;  %3696 = vmatpush1.bf16.msra.mxu0 %v4485_v38  ;;  %4018 = vst [vmem:[#allocation9 + $0x58] sm:$0xff] %v4002_v52  ;;  %3868 = vmatpush1.bf16.msra.mxu1 %v4487_v39  ;;  %v4536_v31 = vcombine.high %v581_v24, %v585_v53  ;;  %v4533_v35 = vcombine.low %v580_v22, %v584_v23  ;;  %v600_v38 = vld [vmem:[#allocation6 + $0xfb0] sm:$0xff]  ;;  %v597_v39 = vld [vmem:[#allocation6 + $0xf98] sm:$0xff] }
 0x214   :  { %3697 = vmatprep.subr.bf16.mxu0 %v4494_v47  ;;  %3869 = vmatprep.subr.bf16.mxu1 %v4496_v49  ;;  %v4535_v36 = vcombine.low %v581_v24, %v585_v53  ;;  %v4542_v15 = vcombine.high %v588_v32, %v592_v33  ;;  %v4544_v17 = vcombine.high %v589_v58, %v593_v34  ;;  %v601_v40 = vld [vmem:[#allocation6 + $0xfb8] sm:$0xff]  ;;  %v604_v27 = vld [vmem:[#allocation6 + $0xfd0] sm:$0xff] }
 0x215   :  { %v4541_v41 = vcombine.low %v588_v32, %v592_v33  ;;  %v4543_v42 = vcombine.low %v589_v58, %v593_v34  ;;  %v4550_v44 = vcombine.high %v596_v18, %v600_v38  ;;  %v4552_v47 = vcombine.high %v597_v39, %v601_v40  ;;  %v608_v25 = vld [vmem:[#allocation6 + $0xff0] sm:$0xff]  ;;  %v605_v48 = vld [vmem:[#allocation6 + $0xfd8] sm:$0xff] }
 0x216   :  { %v609_v49 = vld [vmem:[#allocation6 + $0xff8] sm:$0xff]  ;;  %v4549_v50 = vcombine.low %v596_v18, %v600_v38  ;;  %v4551_v51 = vcombine.low %v597_v39, %v601_v40  ;;  %v4558_v52 = vcombine.high %v604_v27, %v608_v25  ;;  %v4557_v29 = vcombine.low %v604_v27, %v608_v25 }
 0x217   :  { %3698 = vmatpush1.bf16.msra.mxu0 %v4493_v30  ;;  %3870 = vmatpush1.bf16.msra.mxu1 %v4495_v56  ;;  %v4560_v43 = vcombine.high %v605_v48, %v609_v49  ;;  %v4559_v30 = vcombine.low %v605_v48, %v609_v49  ;;  %v3969_v56 = vsub.s32 4, %v4860_v60 }
 0x218   :  { %3699 = vmatprep.subr.bf16.mxu0 %v4502_v37  ;;  %3871 = vmatprep.subr.bf16.mxu1 %v4504_v57  ;;  %v3977_v37 = vsub.s32 6, %v4860_v60  ;;  %v3973_v57 = vsub.s32 5, %v4860_v60 }
 0x219   :  { %v3970_v61 = vrot.slane %v4863_v7, %v3969_v56 }
 0x21a   :  { %v3978_v62 = vrot.slane %v4863_v7, %v3977_v37  ;;  %v3974_v55 = vrot.slane %v4863_v7, %v3973_v57 }
 0x21b   :  { %3700 = vmatpush1.bf16.msra.mxu0 %v4501_v63  ;;  %3872 = vmatpush1.bf16.msra.mxu1 %v4503_v0  ;;  %v3982_v63 = vrot.slane %v4863_v7, %v3981_v59 }
 0x21c   :  { %3701 = vmatprep.subr.bf16.mxu0 %v4510_v2  ;;  %3873 = vmatprep.subr.bf16.mxu1 %v4512_v3 }
 0x21f   :  { %3702 = vmatpush1.bf16.msra.mxu0 %v4509_v9  ;;  %3874 = vmatpush1.bf16.msra.mxu1 %v4511_v10 }
 0x220   :  { %3703 = vmatprep.subr.bf16.mxu0 %v4518_v11  ;;  %3875 = vmatprep.subr.bf16.mxu1 %v4520_v45 }
 0x223   :  { %3704 = vmatpush1.bf16.msra.mxu0 %v4517_v16  ;;  %3876 = vmatpush1.bf16.msra.mxu1 %v4519_v19 }
 0x224   :  { %3705 = vmatprep.subr.bf16.mxu0 %v4526_v20  ;;  %3877 = vmatprep.subr.bf16.mxu1 %v4528_v21 }
 0x227   :  { %3706 = vmatpush1.bf16.msra.mxu0 %v4525_v54  ;;  %3878 = vmatpush1.bf16.msra.mxu1 %v4527_v26 }
 0x228   :  { %3707 = vmatprep.subr.bf16.mxu0 %v4534_v28  ;;  %3879 = vmatprep.subr.bf16.mxu1 %v4536_v31 }
 0x22b   :  { %3708 = vmatpush1.bf16.msra.mxu0 %v4533_v35  ;;  %3880 = vmatpush1.bf16.msra.mxu1 %v4535_v36 }
 0x22c   :  { %3709 = vmatprep.subr.bf16.mxu0 %v4542_v15  ;;  %3881 = vmatprep.subr.bf16.mxu1 %v4544_v17 }
 0x22f   :  { %3710 = vmatpush1.bf16.msra.mxu0 %v4541_v41  ;;  %3882 = vmatpush1.bf16.msra.mxu1 %v4543_v42 }
 0x230   :  { %3711 = vmatprep.subr.bf16.mxu0 %v4550_v44  ;;  %3883 = vmatprep.subr.bf16.mxu1 %v4552_v47 }
 0x233   :  { %3712 = vmatpush1.bf16.msra.mxu0 %v4549_v50  ;;  %3884 = vmatpush1.bf16.msra.mxu1 %v4551_v51 }
 0x234   :  { %3713 = vmatprep.subr.bf16.mxu0 %v4558_v52  ;;  %3885 = vmatprep.subr.bf16.mxu1 %v4560_v43 }
 0x237   :  { %3714 = vmatpush1.bf16.msra.mxu0 %v4557_v29  ;;  %3886 = vmatpush1.bf16.msra.mxu1 %v4559_v30 }
 0x23a   :  { %3716 = vmatmul.mubr.bf16.vlgmr.msra.gmra.mrb[4].mxu0 %v4842_v1  ;;  %3888 = vmatmul.mubr.bf16.vlgmr.msra.gmra.mrb[4].mxu1 %v4842_v1 }
 0x30d   :  { %v3717_v0 = vpop.f32.mrb[4].mxu0  ;;  %v3889_v3 = vpop.f32.mrb[4].mxu1 }
 0x30e   :  { %v3995_v2 = vadd.f32 %v3970_v61, %v3717_v0  ;;  %v3719_v1 = vpop.f32.mrb[5].mxu0  ;;  %v3997_v4 = vadd.f32 %v3978_v62, %v3889_v3  ;;  %v3891_v6 = vpop.f32.mrb[5].mxu1 }
 0x30f   :  { %v3996_v5 = vadd.f32 %v3974_v55, %v3719_v1  ;;  %v3721_v8 = vpop.f32.mrb[6].mxu0  ;;  %v3998_v60 = vadd.f32 %v3982_v63, %v3891_v6  ;;  %v3893_v10 = vpop.f32.mrb[6].mxu1 }
 0x310   :  { %4011 = vst [vmem:[#allocation9 + $0x20] sm:$0xff] %v3995_v2  ;;  %v4003_v9 = vadd.f32 %v3970_v61, %v3721_v8  ;;  %v3723_v11 = vpop.f32.mrb[7].mxu0  ;;  %4013 = vst [vmem:[#allocation9 + $0x30] sm:$0xff] %v3997_v4  ;;  %v4005_v45 = vadd.f32 %v3978_v62, %v3893_v10  ;;  %v3895_v7 = vpop.f32.mrb[7].mxu1 }
 0x311   :  { %4012 = vst [vmem:[#allocation9 + $0x28] sm:$0xff] %v3996_v5  ;;  %v4004_v46 = vadd.f32 %v3974_v55, %v3723_v11  ;;  %4014 = vst [vmem:[#allocation9 + $0x38] sm:$0xff] %v3998_v60  ;;  %v4006_v12 = vadd.f32 %v3982_v63, %v3895_v7 }
 0x312   :  { %4019 = vst [vmem:[#allocation9 + $0x60] sm:$0xff] %v4003_v9  ;;  %4021 = vst [vmem:[#allocation9 + $0x70] sm:$0xff] %v4005_v45 }
 0x313   :  { %4020 = vst [vmem:[#allocation9 + $0x68] sm:$0xff] %v4004_v46  ;;  %4022 = vst [vmem:[#allocation9 + $0x78] sm:$0xff] %v4006_v12 }
 0x314   :  { %4694 = shalt.err (!%p4691_p0)
}
 0x315   :  { %s4695_s25 = scalar_lea.hbm %s4897_s3, 2048 }
 0x316   :  { %p4696_p1 = scmp.ne.s32.totalorder %s4897_s3, %s4695_s25  ;;  %p4699_p2 = scmp.lt.u32.totalorder %s4695_s25, %s4897_s3 }
 0x318   :  { %p4701_p3 = pnand %p4699_p2, %p4696_p1 }
 0x31a   :  { %4704 = shalt.err (!%p4701_p3)
}
 0x31b   :  { %s4717_s30 = smov 1024   ;;  %s4718_s4 = smov 64  }
 0x31c   :  { %4034 = dma.vmem_to_hbm [thread:$0]  %s4029_s21, 2048, %s4897_s3, [#allocation5], %s4717_s30, %s4717_s30, %s4718_s4  }
 0x31d   :  { %4709 = dma.done.wait [#allocation5], 2048  }
 0x31e   :  { %4710 = vsyncadd [#allocation5], 4294965248 }
 0x31f   :  { %4038 = vsyncpa [#allocation4], 1 }
 0x320   :  { %4039 = vsyncpa [#allocation7], 1 }
 0x321   :  { %4040 = vsyncpa [#allocation5], 1 }

</bundles_post_ra>
